<compile_context>
chip_gen: v5e
topology: v5e:2x2
jax: 0.10.0
libtpu: 0.0.40
codegen_flags: <defaults>
</compile_context>

<pallas_src>
import functools
import math

import jax
import jax.numpy as jnp
from jax.experimental import pallas as pl
from jax.experimental.pallas import tpu as pltpu


# ----------------------------- fused dual-direction GAT layer kernel -----------------------------

def _gat_dual_layer_kernel(
    n_feat_ref, e_feat_ref, mask_ref,            # shared VMEM inputs: (N,F), (E,F), (E,T)
    src_col_ref, dst_col_ref, dst_row_ref,       # per-direction int32 indices: (E,1), (E,1), (1,E)
    w_node_ref, w_edge_ref,                      # per-direction fused weights: (F, HD+2HT), (F, HD+HT)
    o_n_ref, o_e_ref,                            # per-direction lane-padded outputs: (N,P), (E,P)
    *, num_heads, head_dim, edge_types, cat, activation, negative_slope, out_pad):
    H, D, T = num_heads, head_dim, edge_types
    HD, HT = H * D, H * T
    N = n_feat_ref.shape[0]
    E = e_feat_ref.shape[0]
    f32 = jnp.float32

    # ---- single fused projection per side (fc_n/fc_e + all per-head attention projections) ----
    proj_n = jnp.dot(n_feat_ref[...], w_node_ref[...], preferred_element_type=f32)   # (N, HD+2HT)
    proj_e = jnp.dot(e_feat_ref[...], w_edge_ref[...], preferred_element_type=f32)   # (E, HD+HT)
    feat_src = proj_n[:, 0:HD]
    el = proj_n[:, HD:HD + HT]
    er = proj_n[:, HD + HT:HD + 2 * HT]
    feat_edge = proj_e[:, 0:HD]
    em = proj_e[:, HD:HD + HT]

    # ---- one-hot gather / scatter operators built in VMEM from edge indices (VPU compares) ----
    col_en = jax.lax.broadcasted_iota(jnp.int32, (E, N), 1)
    gather_src = (col_en == src_col_ref[...]).astype(f32)     # (E,N): row e selects node src[e]
    gather_dst = (col_en == dst_col_ref[...]).astype(f32)     # (E,N): row e selects node dst[e]
    row_ne = jax.lax.broadcasted_iota(jnp.int32, (N, E), 0)
    scatter_dst = (row_ne == dst_row_ref[...]).astype(f32)    # (N,E): row n sums edges with dst==n

    # ---- constant selector matrices (avoid integer div/mod on vectors) ----
    ht_r = jax.lax.broadcasted_iota(jnp.int32, (HT, H), 0)
    ht_c = jax.lax.broadcasted_iota(jnp.int32, (HT, H), 1)
    head_sum = ((ht_r >= ht_c * T) & (ht_r < ht_c * T + T)).astype(f32)     # (HT,H): sum T cols/head
    hd_r = jax.lax.broadcasted_iota(jnp.int32, (H, HD), 0)
    hd_c = jax.lax.broadcasted_iota(jnp.int32, (H, HD), 1)
    head_expand = ((hd_c >= hd_r * D) & (hd_c < hd_r * D + D)).astype(f32)  # (H,HD): repeat D cols/head

    # ---- edge scores: (el[src] + er[dst] + em) masked by edge type, summed per head ----
    comb = (jnp.dot(gather_src, el, preferred_element_type=f32)
            + jnp.dot(gather_dst, er, preferred_element_type=f32)
            + em)                                                           # (E, HT)
    mask_ht = jnp.tile(mask_ref[...], (1, H))                               # (E, HT)
    score = jnp.dot(comb * mask_ht, head_sum, preferred_element_type=f32)   # (E, H)
    score = jnp.where(score >= 0.0, score, negative_slope * score)          # LeakyReLU

    # ---- edge softmax over incoming edges (global-max shift: identical result to per-dst max
    #      by shift invariance; exact division; 0-in-degree rows stay 0) ----
    score = score - jnp.max(score, axis=0, keepdims=True)
    p = jnp.exp(score)                                                      # (E, H)
    den = jnp.dot(scatter_dst, p, preferred_element_type=f32)               # (N, H)
    inv = jnp.where(den > 0.0, 1.0 / den, 0.0)

    # ---- weighted message passing: rst_n[d] = sum_{e: dst=d} alpha[e] * feat_src[src[e]] ----
    feat_src_e = jnp.dot(gather_src, feat_src, preferred_element_type=f32)  # (E, HD)
    w_head = jnp.dot(p, head_expand, preferred_element_type=f32)            # (E, HD)
    rst_num = jnp.dot(scatter_dst, feat_src_e * w_head, preferred_element_type=f32)   # (N, HD)
    rst_n = rst_num * jnp.dot(inv, head_expand, preferred_element_type=f32)

    # ---- edge_mean_udf: rst_e = (feat_edge + rst_n[src] + rst_n[dst]) / 3 ----
    rst_e = (feat_edge
             + jnp.dot(gather_src, rst_n, preferred_element_type=f32)
             + jnp.dot(gather_dst, rst_n, preferred_element_type=f32)) * (1.0 / 3.0)

    def finalize(x):
        if not cat:                                    # mean over heads
            acc = x[:, 0:D]
            for h in range(1, H):
                acc = acc + x[:, h * D:(h + 1) * D]
            x = acc * (1.0 / H)
        if activation == 'relu':
            x = jnp.maximum(x, 0.0)
        elif activation == 'sigmoid':
            x = 0.5 * (jnp.tanh(0.5 * x) + 1.0)        # numerically stable sigmoid
        pad = out_pad - x.shape[1]
        if pad > 0:                                    # lane-dense single full-width store
            x = jnp.concatenate([x, jnp.zeros((x.shape[0], pad), f32)], axis=1)
        return x

    o_n_ref[...] = finalize(rst_n)
    o_e_ref[...] = finalize(rst_e)
    # TODO(synk): residual path (res_fc_n/res_fc_e) and use_static_feature branch are disabled
    #             in this config (residual=False, use_static_feature=False) and not implemented.


def _plain_spec(shape):
    nd = len(shape)
    return pl.BlockSpec(shape, lambda i, nd=nd: (0,) * nd)


def _dir_spec(shape):
    # (2, ...) direction-stacked array: squeeze the direction axis, full block otherwise.
    block = (None,) + tuple(shape[1:])
    nd = len(shape) - 1
    return pl.BlockSpec(block, lambda d, nd=nd: (d,) + (0,) * nd)


def gat_dual_layer_forward(w_node, w_edge, graph_arrays, feat, *, cat, activation,
                           negative_slope=0.2):
    src_col, dst_col, dst_row, mask = graph_arrays
    n_feat, e_feat = feat
    N, E = n_feat.shape[0], e_feat.shape[0]
    T = mask.shape[1]
    HT = w_node.shape[2] - w_edge.shape[2]
    HD = w_edge.shape[2] - HT
    H = HT // T
    D = HD // H
    out_cols = HD if cat else D
    out_pad = ((out_cols + 127) // 128) * 128

    kernel = functools.partial(
        _gat_dual_layer_kernel, num_heads=H, head_dim=D, edge_types=T,
        cat=cat, activation=activation, negative_slope=negative_slope, out_pad=out_pad)

    o_n, o_e = pl.pallas_call(
        kernel,
        grid=(2,),                                     # forward-graph / inverse-graph direction
        in_specs=[
            _plain_spec(n_feat.shape), _plain_spec(e_feat.shape), _plain_spec(mask.shape),
            _dir_spec(src_col.shape), _dir_spec(dst_col.shape), _dir_spec(dst_row.shape),
            _dir_spec(w_node.shape), _dir_spec(w_edge.shape),
        ],
        out_specs=[
            pl.BlockSpec((None, N, out_pad), lambda d: (d, 0, 0)),
            pl.BlockSpec((None, E, out_pad), lambda d: (d, 0, 0)),
        ],
        out_shape=(jax.ShapeDtypeStruct((2, N, out_pad), jnp.float32),
                   jax.ShapeDtypeStruct((2, E, out_pad), jnp.float32)),
        compiler_params=pltpu.CompilerParams(
            dimension_semantics=("parallel",),         # v7x: one TensorCore per direction
            vmem_limit_bytes=32 * 1024 * 1024),
    )(n_feat, e_feat, mask, src_col, dst_col, dst_row, w_node, w_edge)

    # sum forward + inverse contributions, drop the lane padding (cheap XLA slice)
    return ((o_n[0] + o_n[1])[:, :out_cols], (o_e[0] + o_e[1])[:, :out_cols])


# ----------------------------- fused (node + edge) GRUCell + predictor kernel -----------------------------

def _gru_predictor_pair_kernel(xn_ref, xe_ref, hid_ref,
                               n_wih_t_ref, n_whh_t_ref, n_bih_ref, n_bhh_ref,
                               e_wih_t_ref, e_whh_t_ref, e_bih_ref, e_bhh_ref,
                               n_wp_t_ref, n_bp_ref, e_wp_t_ref, e_bp_ref,
                               out_ref, *, hidden_dim, out_pad):
    Hd = hidden_dim
    f32 = jnp.float32

    def sigmoid(v):
        return 0.5 * (jnp.tanh(0.5 * v) + 1.0)

    def gru(x, h, wih_t, whh_t, bih, bhh):
        gi = jnp.dot(x, wih_t, preferred_element_type=f32) + bih
        gh = jnp.dot(h, whh_t, preferred_element_type=f32) + bhh
        r = sigmoid(gi[:, 0:Hd] + gh[:, 0:Hd])
        z = sigmoid(gi[:, Hd:2 * Hd] + gh[:, Hd:2 * Hd])
        n = jnp.tanh(gi[:, 2 * Hd:3 * Hd] + r * gh[:, 2 * Hd:3 * Hd])
        return (1.0 - z) * n + z * h

    h_prev = hid_ref[...]
    h_n = gru(xn_ref[...], h_prev, n_wih_t_ref[...], n_whh_t_ref[...], n_bih_ref[...], n_bhh_ref[...])
    h_e = gru(xe_ref[...], h_prev, e_wih_t_ref[...], e_whh_t_ref[...], e_bih_ref[...], e_bhh_ref[...])
    p_n = sigmoid(jnp.dot(h_n, n_wp_t_ref[...], preferred_element_type=f32) + n_bp_ref[...])
    p_e = jnp.maximum(jnp.dot(h_e, e_wp_t_ref[...], preferred_element_type=f32) + e_bp_ref[...], 0.0)

    rows = h_n.shape[0]
    pad = out_pad - (2 * Hd + 2)
    out_ref[...] = jnp.concatenate(                      # one lane-dense 128-wide slab
        [h_n, h_e, p_n, p_e, jnp.zeros((rows, pad), f32)], axis=1)


def gru_predictor_pair_forward(ar_prepared, x_n, x_e, hid):
    R, Hd = hid.shape
    out_pad = ((2 * Hd + 2 + 127) // 128) * 128
    ng, eg = ar_prepared['n_gru'], ar_prepared['e_gru']
    npd, epd = ar_prepared['n_pred'], ar_prepared['e_pred']
    args = (x_n, x_e, hid,
            ng['wih_t'], ng['whh_t'], ng['bih'], ng['bhh'],
            eg['wih_t'], eg['whh_t'], eg['bih'], eg['bhh'],
            npd['w_t'], npd['b'], epd['w_t'], epd['b'])
    kernel = functools.partial(_gru_predictor_pair_kernel, hidden_dim=Hd, out_pad=out_pad)
    slab = pl.pallas_call(
        kernel,
        grid=(1,),
        in_specs=[_plain_spec(a.shape) for a in args],
        out_specs=_plain_spec((R, out_pad)),
        out_shape=jax.ShapeDtypeStruct((R, out_pad), jnp.float32),
        compiler_params=pltpu.CompilerParams(
            dimension_semantics=("arbitrary",),
            vmem_limit_bytes=32 * 1024 * 1024),
    )(*args)
    h_n = slab[:, 0:Hd]
    h_e = slab[:, Hd:2 * Hd]
    p_n = slab[:, 2 * Hd:2 * Hd + 1]
    p_e = slab[:, 2 * Hd + 1:2 * Hd + 2]
    return h_n, p_n, h_e, p_e


# ----------------------------- parameter init (matches the PyTorch reference) -----------------------------

_GAIN = math.sqrt(2.0)  # nn.init.calculate_gain('relu')


def _xavier_normal(key, shape, fan_in, fan_out, gain=_GAIN):
    std = gain * math.sqrt(2.0 / (fan_in + fan_out))
    return std * jax.random.normal(key, shape, dtype=jnp.float32)


def init_gat_layer_params(key, in_dim, out_dim, num_heads, edge_type_num):
    k = jax.random.split(key, 5)
    hd = num_heads * out_dim
    rf = out_dim * edge_type_num
    return dict(
        w_n=_xavier_normal(k[0], (hd, in_dim), in_dim, hd),
        w_e=_xavier_normal(k[1], (hd, in_dim), in_dim, hd),
        attn_l=_xavier_normal(k[2], (num_heads, out_dim, edge_type_num), num_heads * rf, rf),
        attn_r=_xavier_normal(k[3], (num_heads, out_dim, edge_type_num), num_heads * rf, rf),
        attn_m=_xavier_normal(k[4], (num_heads, out_dim, edge_type_num), num_heads * rf, rf),
    )


def init_gat_params(key, in_dim, num_layers, num_hidden, out_dim, heads, edge_type_num):
    dims = [(in_dim, num_hidden, heads[0])]
    for l in range(1, num_layers):
        dims.append((num_hidden * heads[l - 1], num_hidden, heads[l]))
    dims.append((num_hidden * heads[-2], out_dim, heads[-1]))
    keys = jax.random.split(key, 2 * len(dims))
    layers, ilayers = [], []
    for i, (din, dout, h) in enumerate(dims):
        layers.append(init_gat_layer_params(keys[2 * i], din, dout, h, edge_type_num))
        ilayers.append(init_gat_layer_params(keys[2 * i + 1], din, dout, h, edge_type_num))
    return layers, ilayers


def init_gru_cell(key, input_dim, hidden_dim):
    k = 1.0 / math.sqrt(hidden_dim)
    ks = jax.random.split(key, 4)
    return dict(
        w_ih=jax.random.uniform(ks[0], (3 * hidden_dim, input_dim), jnp.float32, -k, k),
        w_hh=jax.random.uniform(ks[1], (3 * hidden_dim, hidden_dim), jnp.float32, -k, k),
        b_ih=jax.random.uniform(ks[2], (3 * hidden_dim,), jnp.float32, -k, k),
        b_hh=jax.random.uniform(ks[3], (3 * hidden_dim,), jnp.float32, -k, k),
    )


def init_linear(key, in_f, out_f):
    k = 1.0 / math.sqrt(in_f)
    k1, k2 = jax.random.split(key)
    return dict(w=jax.random.uniform(k1, (out_f, in_f), jnp.float32, -k, k),
                b=jax.random.uniform(k2, (out_f,), jnp.float32, -k, k))


def init_ar_generator(key, feat_dim, hidden_dim):
    k = jax.random.split(key, 4)
    # TODO(synk): n_predictor_sigma2 / e_predictor_sigma2 are constructed in the reference
    #             but never used in forward; omitted.
    return dict(n_gru=init_gru_cell(k[0], feat_dim, hidden_dim),
                e_gru=init_gru_cell(k[1], feat_dim, hidden_dim),
                n_pred=init_linear(k[2], hidden_dim, 1),
                e_pred=init_linear(k[3], hidden_dim, 1))


# ----------------------------- param preparation (once, outside jit) -----------------------------

def _fuse_gat_layer_weights(p):
    """Fold per-head attention projections into the fc matmuls: one fused weight per side."""
    w_n_t = p['w_n'].T                               # (F_in, H*D)
    w_e_t = p['w_e'].T
    H, D, T = p['attn_l'].shape

    def head_fuse(w_t, attn):                        # -> (F_in, H*T)
        return jnp.concatenate([w_t[:, h * D:(h + 1) * D] @ attn[h] for h in range(H)], axis=1)

    w_node = jnp.concatenate(
        [w_n_t, head_fuse(w_n_t, p['attn_l']), head_fuse(w_n_t, p['attn_r'])], axis=1)
    w_edge = jnp.concatenate([w_e_t, head_fuse(w_e_t, p['attn_m'])], axis=1)
    return w_node, w_edge


def prepare_generator_params(gen_params):
    layers, ilayers = gen_params
    prepared = []
    for lf, li in zip(layers, ilayers):
        wn_f, we_f = _fuse_gat_layer_weights(lf)
        wn_i, we_i = _fuse_gat_layer_weights(li)
        prepared.append(dict(w_node=jnp.stack([wn_f, wn_i]),     # (2, F_in, HD+2HT)
                             w_edge=jnp.stack([we_f, we_i])))    # (2, F_in, HD+HT)
    return prepared


def prepare_ar_params(ar_params):
    def prep_gru(g):
        return dict(wih_t=g['w_ih'].T, whh_t=g['w_hh'].T,
                    bih=g['b_ih'][None, :], bhh=g['b_hh'][None, :])

    def prep_lin(p):
        return dict(w_t=p['w'].T, b=p['b'][None, :])

    return dict(n_gru=prep_gru(ar_params['n_gru']), e_gru=prep_gru(ar_params['e_gru']),
                n_pred=prep_lin(ar_params['n_pred']), e_pred=prep_lin(ar_params['e_pred']))


def build_graph_arrays(src, dst, mask):
    """Direction-stacked edge indices: dir 0 = (src,dst) graph, dir 1 = reversed graph."""
    E = src.shape[0]
    src_col = jnp.stack([src, dst]).astype(jnp.int32).reshape(2, E, 1)
    dst_col = jnp.stack([dst, src]).astype(jnp.int32).reshape(2, E, 1)
    dst_row = jnp.stack([dst, src]).astype(jnp.int32).reshape(2, 1, E)
    return (src_col, dst_col, dst_row, mask)


# ----------------------------- generator (GAT) + ArGenerator forward -----------------------------

def _resolve_activation(act):
    # mirrors: None if act=='none' else nn.ReLU() if act=='relu' else nn.Sigmoid()
    if act == 'none':
        return None
    if act == 'relu':
        return 'relu'
    return 'sigmoid'


def gat_forward(prepared_layers, graph_arrays, in_feat, activation='relu', negative_slope=0.2):
    act_mid = _resolve_activation(activation)
    act_last = _resolve_activation(None)   # reference quirk: passing None selects Sigmoid
    h = in_feat
    for layer in prepared_layers[:-1]:
        h = gat_dual_layer_forward(layer['w_node'], layer['w_edge'], graph_arrays, h,
                                   cat=True, activation=act_mid, negative_slope=negative_slope)
    last = prepared_layers[-1]
    return gat_dual_layer_forward(last['w_node'], last['w_edge'], graph_arrays, h,
                                  cat=False, activation=act_last, negative_slope=negative_slope)


def ar_generator_forward(ar_prepared, gen_prepared, graph_arrays, in_feat, hid_feat,
                         activation='relu'):
    # x_n, x_e = generator(g, in_feat)
    x_n, x_e = gat_forward(gen_prepared, graph_arrays, in_feat, activation)
    # Reference feeds the same hid_feat buffer to both GRU cells; the 3-D .view(-1, dim)
    # reshapes collapse to identity for these 2-D (rows, dim) tensors (demo uses E == N).
    return gru_predictor_pair_forward(ar_prepared, x_n, x_e, hid_feat)


# ----------------------------- demo -----------------------------

if __name__ == "__main__":
    key = jax.random.PRNGKey(0)
    N = 16                               # nodes; graph built with E == N so hid_feat fits both GRU cells
    T = 3                                # edge types
    IN_DIM, NUM_LAYERS, NUM_HIDDEN, OUT_DIM = 8, 1, 8, 8
    HEADS = [2, 2]
    GRU_HIDDEN = 16

    k_graph, k_type, k_nfeat, k_efeat, k_params, k_ar, k_hid = jax.random.split(key, 7)

    # ring edges with a few redirected destinations -> irregular in-degrees (0/1/2),
    # exercising the zero-in-degree guard inside the fused kernel.
    src = jnp.arange(N, dtype=jnp.int32)
    dst = (src + 1) % N
    redirect = jax.random.randint(k_graph, (4,), 0, N, dtype=jnp.int32)
    dst = dst.at[jnp.arange(4)].set(redirect)
    E = N

    etype = jax.random.randint(k_type, (E,), 0, T, dtype=jnp.int32)
    mask = jax.nn.one_hot(etype, T, dtype=jnp.float32)               # graph.edata['mask']

    n_raw = jax.random.normal(k_nfeat, (N, IN_DIM), dtype=jnp.float32)   # ndata['raw_pro']
    e_raw = jax.random.normal(k_efeat, (E, IN_DIM), dtype=jnp.float32)   # edata['raw_pro']

    graph_arrays = build_graph_arrays(src, dst, mask)                # fwd + reversed graph

    gen_params = init_gat_params(k_params, IN_DIM, NUM_LAYERS, NUM_HIDDEN, OUT_DIM, HEADS, T)
    ar_params = init_ar_generator(k_ar, OUT_DIM, GRU_HIDDEN)
    hid_feat = jax.random.normal(k_hid, (N, GRU_HIDDEN), dtype=jnp.float32)

    gen_prepared = prepare_generator_params(gen_params)   # fused + direction-stacked (outside jit)
    ar_prepared = prepare_ar_params(ar_params)            # pre-transposed GRU / predictor weights

    fwd = jax.jit(lambda gp, ap, hid: ar_generator_forward(
        ap, gp, graph_arrays, (n_raw, e_raw), hid, activation='relu'))

    h_n, p_n, h_e, p_e = fwd(gen_prepared, ar_prepared, hid_feat)
    jax.block_until_ready((h_n, p_n, h_e, p_e))

    assert h_n.shape == (N, GRU_HIDDEN) and p_n.shape == (N, 1)
    assert h_e.shape == (E, GRU_HIDDEN) and p_e.shape == (E, 1)
    assert bool(jnp.all(jnp.isfinite(h_n))) and bool(jnp.all(jnp.isfinite(p_n)))
    assert bool(jnp.all(jnp.isfinite(h_e))) and bool(jnp.all(jnp.isfinite(p_e)))
    assert bool(jnp.all(p_n >= 0.0)) and bool(jnp.all(p_n <= 1.0))   # sigmoid predictor
    assert bool(jnp.all(p_e >= 0.0))                                 # relu predictor
    print("KERNEL_OK")
</pallas_src>

<mosaic_0001>
module attributes {stable_mosaic.version = 11 : i64} {
  func.func @_gat_dual_layer_kernel(%arg0: i32, %arg1: memref<16x8xf32, #tpu.memory_space<vmem>>, %arg2: memref<16x8xf32, #tpu.memory_space<vmem>>, %arg3: memref<16x3xf32, #tpu.memory_space<vmem>>, %arg4: memref<1x16x1xi32, #tpu.memory_space<vmem>>, %arg5: memref<1x16x1xi32, #tpu.memory_space<vmem>>, %arg6: memref<1x1x16xi32, #tpu.memory_space<vmem>>, %arg7: memref<1x8x28xf32, #tpu.memory_space<vmem>>, %arg8: memref<1x8x22xf32, #tpu.memory_space<vmem>>, %arg9: memref<1x16x128xf32, #tpu.memory_space<vmem>>, %arg10: memref<1x16x128xf32, #tpu.memory_space<vmem>>) attributes {dimension_semantics = [#tpu.dimension_semantics<parallel>], iteration_bounds = array<i64: 2>, scalar_prefetch = 0 : i64, scratch_operands = 0 : i64, tpu.core_type = #tpu.core_type<tc>, window_params = [{pipeline_mode = #tpu.pipeline_mode<synchronous>, transform_indices = @transform_0, window_bounds = array<i64: 16, 8>}, {pipeline_mode = #tpu.pipeline_mode<synchronous>, transform_indices = @transform_1, window_bounds = array<i64: 16, 8>}, {pipeline_mode = #tpu.pipeline_mode<synchronous>, transform_indices = @transform_2, window_bounds = array<i64: 16, 3>}, {transform_indices = @transform_3, window_bounds = array<i64: 1, 16, 1>}, {transform_indices = @transform_4, window_bounds = array<i64: 1, 16, 1>}, {transform_indices = @transform_5, window_bounds = array<i64: 1, 1, 16>}, {transform_indices = @transform_6, window_bounds = array<i64: 1, 8, 28>}, {transform_indices = @transform_7, window_bounds = array<i64: 1, 8, 22>}, {transform_indices = @transform_8, window_bounds = array<i64: 1, 16, 128>}, {transform_indices = @transform_9, window_bounds = array<i64: 1, 16, 128>}]} {
    %c0 = arith.constant 0 : index
    %c0_0 = arith.constant 0 : index
    %0 = vector.load %arg1[%c0, %c0_0] : memref<16x8xf32, #tpu.memory_space<vmem>>, vector<16x8xf32>
    %c0_1 = arith.constant 0 : index
    %c0_2 = arith.constant 0 : index
    %c0_3 = arith.constant 0 : index
    %1 = vector.load %arg7[%c0_1, %c0_2, %c0_3] : memref<1x8x28xf32, #tpu.memory_space<vmem>>, vector<1x8x28xf32>
    %2 = vector.shape_cast %1 : vector<1x8x28xf32> to vector<8x28xf32>
    %cst = arith.constant dense<0.000000e+00> : vector<16x28xf32>
    %3 = tpu.matmul %0, %2, %cst {dimension_numbers = #tpu.dot_dimension_numbers<[1], [0], [0], [1], [0, 0, 1, 1], [], []>} : vector<16x8xf32>, vector<8x28xf32>, vector<16x28xf32> -> vector<16x28xf32>
    %c0_4 = arith.constant 0 : index
    %c0_5 = arith.constant 0 : index
    %4 = vector.load %arg2[%c0_4, %c0_5] : memref<16x8xf32, #tpu.memory_space<vmem>>, vector<16x8xf32>
    %c0_6 = arith.constant 0 : index
    %c0_7 = arith.constant 0 : index
    %c0_8 = arith.constant 0 : index
    %5 = vector.load %arg8[%c0_6, %c0_7, %c0_8] : memref<1x8x22xf32, #tpu.memory_space<vmem>>, vector<1x8x22xf32>
    %6 = vector.shape_cast %5 : vector<1x8x22xf32> to vector<8x22xf32>
    %cst_9 = arith.constant dense<0.000000e+00> : vector<16x22xf32>
    %7 = tpu.matmul %4, %6, %cst_9 {dimension_numbers = #tpu.dot_dimension_numbers<[1], [0], [0], [1], [0, 0, 1, 1], [], []>} : vector<16x8xf32>, vector<8x22xf32>, vector<16x22xf32> -> vector<16x22xf32>
    %8 = vector.extract_strided_slice %3 {offsets = [0, 0], sizes = [16, 16], strides = [1, 1]} : vector<16x28xf32> to vector<16x16xf32>
    %9 = vector.extract_strided_slice %3 {offsets = [0, 16], sizes = [16, 6], strides = [1, 1]} : vector<16x28xf32> to vector<16x6xf32>
    %10 = vector.extract_strided_slice %3 {offsets = [0, 22], sizes = [16, 6], strides = [1, 1]} : vector<16x28xf32> to vector<16x6xf32>
    %11 = vector.extract_strided_slice %7 {offsets = [0, 0], sizes = [16, 16], strides = [1, 1]} : vector<16x22xf32> to vector<16x16xf32>
    %12 = vector.extract_strided_slice %7 {offsets = [0, 16], sizes = [16, 6], strides = [1, 1]} : vector<16x22xf32> to vector<16x6xf32>
    %13 = tpu.iota {dimensions = array<i32: 1>} : vector<16x16xi32>
    %c0_10 = arith.constant 0 : index
    %c0_11 = arith.constant 0 : index
    %c0_12 = arith.constant 0 : index
    %14 = vector.load %arg4[%c0_10, %c0_11, %c0_12] : memref<1x16x1xi32, #tpu.memory_space<vmem>>, vector<1x16x1xi32>
    %15 = vector.shape_cast %14 : vector<1x16x1xi32> to vector<16x1xi32>
    %16 = vector.broadcast %15 : vector<16x1xi32> to vector<16x16xi32>
    %17 = arith.cmpi eq, %13, %16 : vector<16x16xi32>
    %18 = arith.extui %17 : vector<16x16xi1> to vector<16x16xi32>
    %19 = arith.sitofp %18 : vector<16x16xi32> to vector<16x16xf32>
    %c0_13 = arith.constant 0 : index
    %c0_14 = arith.constant 0 : index
    %c0_15 = arith.constant 0 : index
    %20 = vector.load %arg5[%c0_13, %c0_14, %c0_15] : memref<1x16x1xi32, #tpu.memory_space<vmem>>, vector<1x16x1xi32>
    %21 = vector.shape_cast %20 : vector<1x16x1xi32> to vector<16x1xi32>
    %22 = vector.broadcast %21 : vector<16x1xi32> to vector<16x16xi32>
    %23 = arith.cmpi eq, %13, %22 : vector<16x16xi32>
    %24 = arith.extui %23 : vector<16x16xi1> to vector<16x16xi32>
    %25 = arith.sitofp %24 : vector<16x16xi32> to vector<16x16xf32>
    %26 = tpu.iota {dimensions = array<i32: 0>} : vector<16x16xi32>
    %c0_16 = arith.constant 0 : index
    %c0_17 = arith.constant 0 : index
    %c0_18 = arith.constant 0 : index
    %27 = vector.load %arg6[%c0_16, %c0_17, %c0_18] : memref<1x1x16xi32, #tpu.memory_space<vmem>>, vector<1x1x16xi32>
    %28 = vector.shape_cast %27 : vector<1x1x16xi32> to vector<1x16xi32>
    %29 = vector.broadcast %28 : vector<1x16xi32> to vector<16x16xi32>
    %30 = arith.cmpi eq, %26, %29 : vector<16x16xi32>
    %31 = arith.extui %30 : vector<16x16xi1> to vector<16x16xi32>
    %32 = arith.sitofp %31 : vector<16x16xi32> to vector<16x16xf32>
    %33 = tpu.iota {dimensions = array<i32: 0>} : vector<6x2xi32>
    %34 = tpu.iota {dimensions = array<i32: 1>} : vector<6x2xi32>
    %c3_i32 = arith.constant 3 : i32
    %35 = vector.broadcast %c3_i32 : i32 to vector<6x2xi32>
    %36 = arith.muli %34, %35 : vector<6x2xi32>
    %37 = arith.cmpi sge, %33, %36 : vector<6x2xi32>
    %c3_i32_19 = arith.constant 3 : i32
    %38 = vector.broadcast %c3_i32_19 : i32 to vector<6x2xi32>
    %39 = arith.muli %34, %38 : vector<6x2xi32>
    %c3_i32_20 = arith.constant 3 : i32
    %40 = vector.broadcast %c3_i32_20 : i32 to vector<6x2xi32>
    %41 = arith.addi %39, %40 : vector<6x2xi32>
    %42 = arith.cmpi slt, %33, %41 : vector<6x2xi32>
    %43 = arith.andi %37, %42 : vector<6x2xi1>
    %44 = arith.extui %43 : vector<6x2xi1> to vector<6x2xi32>
    %45 = arith.sitofp %44 : vector<6x2xi32> to vector<6x2xf32>
    %46 = tpu.iota {dimensions = array<i32: 0>} : vector<2x16xi32>
    %47 = tpu.iota {dimensions = array<i32: 1>} : vector<2x16xi32>
    %c8_i32 = arith.constant 8 : i32
    %48 = vector.broadcast %c8_i32 : i32 to vector<2x16xi32>
    %49 = arith.muli %46, %48 : vector<2x16xi32>
    %50 = arith.cmpi sge, %47, %49 : vector<2x16xi32>
    %c8_i32_21 = arith.constant 8 : i32
    %51 = vector.broadcast %c8_i32_21 : i32 to vector<2x16xi32>
    %52 = arith.muli %46, %51 : vector<2x16xi32>
    %c8_i32_22 = arith.constant 8 : i32
    %53 = vector.broadcast %c8_i32_22 : i32 to vector<2x16xi32>
    %54 = arith.addi %52, %53 : vector<2x16xi32>
    %55 = arith.cmpi slt, %47, %54 : vector<2x16xi32>
    %56 = arith.andi %50, %55 : vector<2x16xi1>
    %57 = arith.extui %56 : vector<2x16xi1> to vector<2x16xi32>
    %58 = arith.sitofp %57 : vector<2x16xi32> to vector<2x16xf32>
    %cst_23 = arith.constant dense<0.000000e+00> : vector<16x6xf32>
    %59 = tpu.matmul %19, %9, %cst_23 {dimension_numbers = #tpu.dot_dimension_numbers<[1], [0], [0], [1], [0, 0, 1, 1], [], []>} : vector<16x16xf32>, vector<16x6xf32>, vector<16x6xf32> -> vector<16x6xf32>
    %cst_24 = arith.constant dense<0.000000e+00> : vector<16x6xf32>
    %60 = tpu.matmul %25, %10, %cst_24 {dimension_numbers = #tpu.dot_dimension_numbers<[1], [0], [0], [1], [0, 0, 1, 1], [], []>} : vector<16x16xf32>, vector<16x6xf32>, vector<16x6xf32> -> vector<16x6xf32>
    %61 = arith.addf %59, %60 : vector<16x6xf32>
    %62 = arith.addf %61, %12 : vector<16x6xf32>
    %c0_25 = arith.constant 0 : index
    %c0_26 = arith.constant 0 : index
    %63 = vector.load %arg3[%c0_25, %c0_26] : memref<16x3xf32, #tpu.memory_space<vmem>>, vector<16x3xf32>
    %64 = tpu.concatenate %63, %63 in 1 : vector<16x3xf32>, vector<16x3xf32> -> vector<16x6xf32>
    %65 = arith.mulf %62, %64 : vector<16x6xf32>
    %cst_27 = arith.constant dense<0.000000e+00> : vector<16x2xf32>
    %66 = tpu.matmul %65, %45, %cst_27 {dimension_numbers = #tpu.dot_dimension_numbers<[1], [0], [0], [1], [0, 0, 1, 1], [], []>} : vector<16x6xf32>, vector<6x2xf32>, vector<16x2xf32> -> vector<16x2xf32>
    %cst_28 = arith.constant 0.000000e+00 : f32
    %67 = vector.broadcast %cst_28 : f32 to vector<16x2xf32>
    %68 = arith.cmpf oge, %66, %67 : vector<16x2xf32>
    %cst_29 = arith.constant 2.000000e-01 : f32
    %69 = vector.broadcast %cst_29 : f32 to vector<16x2xf32>
    %70 = arith.mulf %69, %66 : vector<16x2xf32>
    %71 = arith.select %68, %66, %70 : vector<16x2xi1>, vector<16x2xf32>
    %cst_30 = arith.constant dense<0xFF800000> : vector<2xf32>
    %72 = vector.multi_reduction <maximumf>, %71, %cst_30 [0] : vector<16x2xf32> to vector<2xf32>
    %73 = vector.shape_cast %72 : vector<2xf32> to vector<1x2xf32>
    %74 = vector.broadcast %73 : vector<1x2xf32> to vector<16x2xf32>
    %75 = arith.subf %71, %74 : vector<16x2xf32>
    %76 = math.exp %75 : vector<16x2xf32>
    %cst_31 = arith.constant dense<0.000000e+00> : vector<16x2xf32>
    %77 = tpu.matmul %32, %76, %cst_31 {dimension_numbers = #tpu.dot_dimension_numbers<[1], [0], [0], [1], [0, 0, 1, 1], [], []>} : vector<16x16xf32>, vector<16x2xf32>, vector<16x2xf32> -> vector<16x2xf32>
    %cst_32 = arith.constant 0.000000e+00 : f32
    %78 = vector.broadcast %cst_32 : f32 to vector<16x2xf32>
    %79 = arith.cmpf ogt, %77, %78 : vector<16x2xf32>
    %cst_33 = arith.constant 1.000000e+00 : f32
    %80 = vector.broadcast %cst_33 : f32 to vector<16x2xf32>
    %81 = arith.divf %80, %77 : vector<16x2xf32>
    %cst_34 = arith.constant 0.000000e+00 : f32
    %82 = vector.broadcast %cst_34 : f32 to vector<16x2xf32>
    %83 = arith.select %79, %81, %82 : vector<16x2xi1>, vector<16x2xf32>
    %cst_35 = arith.constant dense<0.000000e+00> : vector<16x16xf32>
    %84 = tpu.matmul %19, %8, %cst_35 {dimension_numbers = #tpu.dot_dimension_numbers<[1], [0], [0], [1], [0, 0, 1, 1], [], []>} : vector<16x16xf32>, vector<16x16xf32>, vector<16x16xf32> -> vector<16x16xf32>
    %cst_36 = arith.constant dense<0.000000e+00> : vector<16x16xf32>
    %85 = tpu.matmul %76, %58, %cst_36 {dimension_numbers = #tpu.dot_dimension_numbers<[1], [0], [0], [1], [0, 0, 1, 1], [], []>} : vector<16x2xf32>, vector<2x16xf32>, vector<16x16xf32> -> vector<16x16xf32>
    %86 = arith.mulf %84, %85 : vector<16x16xf32>
    %cst_37 = arith.constant dense<0.000000e+00> : vector<16x16xf32>
    %87 = tpu.matmul %32, %86, %cst_37 {dimension_numbers = #tpu.dot_dimension_numbers<[1], [0], [0], [1], [0, 0, 1, 1], [], []>} : vector<16x16xf32>, vector<16x16xf32>, vector<16x16xf32> -> vector<16x16xf32>
    %cst_38 = arith.constant dense<0.000000e+00> : vector<16x16xf32>
    %88 = tpu.matmul %83, %58, %cst_38 {dimension_numbers = #tpu.dot_dimension_numbers<[1], [0], [0], [1], [0, 0, 1, 1], [], []>} : vector<16x2xf32>, vector<2x16xf32>, vector<16x16xf32> -> vector<16x16xf32>
    %89 = arith.mulf %87, %88 : vector<16x16xf32>
    %cst_39 = arith.constant dense<0.000000e+00> : vector<16x16xf32>
    %90 = tpu.matmul %19, %89, %cst_39 {dimension_numbers = #tpu.dot_dimension_numbers<[1], [0], [0], [1], [0, 0, 1, 1], [], []>} : vector<16x16xf32>, vector<16x16xf32>, vector<16x16xf32> -> vector<16x16xf32>
    %91 = arith.addf %11, %90 : vector<16x16xf32>
    %cst_40 = arith.constant dense<0.000000e+00> : vector<16x16xf32>
    %92 = tpu.matmul %25, %89, %cst_40 {dimension_numbers = #tpu.dot_dimension_numbers<[1], [0], [0], [1], [0, 0, 1, 1], [], []>} : vector<16x16xf32>, vector<16x16xf32>, vector<16x16xf32> -> vector<16x16xf32>
    %93 = arith.addf %91, %92 : vector<16x16xf32>
    %cst_41 = arith.constant 0.333333343 : f32
    %94 = vector.broadcast %cst_41 : f32 to vector<16x16xf32>
    %95 = arith.mulf %93, %94 : vector<16x16xf32>
    %cst_42 = arith.constant 0.000000e+00 : f32
    %96 = vector.broadcast %cst_42 : f32 to vector<16x16xf32>
    %97 = arith.maximumf %89, %96 : vector<16x16xf32>
    %cst_43 = arith.constant 0.000000e+00 : f32
    %98 = vector.broadcast %cst_43 : f32 to vector<16x112xf32>
    %99 = tpu.concatenate %97, %98 in 1 : vector<16x16xf32>, vector<16x112xf32> -> vector<16x128xf32>
    %c0_44 = arith.constant 0 : index
    %c0_45 = arith.constant 0 : index
    %c0_46 = arith.constant 0 : index
    %100 = vector.load %arg9[%c0_44, %c0_45, %c0_46] : memref<1x16x128xf32, #tpu.memory_space<vmem>>, vector<1x16x128xf32>
    %101 = vector.shape_cast %100 : vector<1x16x128xf32> to vector<16x128xf32>
    %102 = vector.shape_cast %99 : vector<16x128xf32> to vector<1x16x128xf32>
    tpu.vector_store %arg9[%c0_44, %c0_45, %c0_46], %102 {strides = array<i32>} : memref<1x16x128xf32, #tpu.memory_space<vmem>>, vector<1x16x128xf32>,
    %cst_47 = arith.constant 0.000000e+00 : f32
    %103 = vector.broadcast %cst_47 : f32 to vector<16x16xf32>
    %104 = arith.maximumf %95, %103 : vector<16x16xf32>
    %cst_48 = arith.constant 0.000000e+00 : f32
    %105 = vector.broadcast %cst_48 : f32 to vector<16x112xf32>
    %106 = tpu.concatenate %104, %105 in 1 : vector<16x16xf32>, vector<16x112xf32> -> vector<16x128xf32>
    %c0_49 = arith.constant 0 : index
    %c0_50 = arith.constant 0 : index
    %c0_51 = arith.constant 0 : index
    %107 = vector.load %arg10[%c0_49, %c0_50, %c0_51] : memref<1x16x128xf32, #tpu.memory_space<vmem>>, vector<1x16x128xf32>
    %108 = vector.shape_cast %107 : vector<1x16x128xf32> to vector<16x128xf32>
    %109 = vector.shape_cast %106 : vector<16x128xf32> to vector<1x16x128xf32>
    tpu.vector_store %arg10[%c0_49, %c0_50, %c0_51], %109 {strides = array<i32>} : memref<1x16x128xf32, #tpu.memory_space<vmem>>, vector<1x16x128xf32>,
    return
  }
  func.func @transform_0(%arg0: i32) -> (i32, i32) {
    %c0_i32 = arith.constant 0 : i32
    %c0_i32_0 = arith.constant 0 : i32
    %c0_i32_1 = arith.constant 0 : i32
    return %c0_i32, %c0_i32_0 : i32, i32
  }
  func.func @transform_1(%arg0: i32) -> (i32, i32) {
    %c0_i32 = arith.constant 0 : i32
    %c0_i32_0 = arith.constant 0 : i32
    %c0_i32_1 = arith.constant 0 : i32
    return %c0_i32, %c0_i32_0 : i32, i32
  }
  func.func @transform_2(%arg0: i32) -> (i32, i32) {
    %c0_i32 = arith.constant 0 : i32
    %c0_i32_0 = arith.constant 0 : i32
    %c0_i32_1 = arith.constant 0 : i32
    return %c0_i32, %c0_i32_0 : i32, i32
  }
  func.func @transform_3(%arg0: i32) -> (i32, i32, i32) {
    %c0_i32 = arith.constant 0 : i32
    %c0_i32_0 = arith.constant 0 : i32
    %c0_i32_1 = arith.constant 0 : i32
    return %arg0, %c0_i32, %c0_i32_0 : i32, i32, i32
  }
  func.func @transform_4(%arg0: i32) -> (i32, i32, i32) {
    %c0_i32 = arith.constant 0 : i32
    %c0_i32_0 = arith.constant 0 : i32
    %c0_i32_1 = arith.constant 0 : i32
    return %arg0, %c0_i32, %c0_i32_0 : i32, i32, i32
  }
  func.func @transform_5(%arg0: i32) -> (i32, i32, i32) {
    %c0_i32 = arith.constant 0 : i32
    %c0_i32_0 = arith.constant 0 : i32
    %c0_i32_1 = arith.constant 0 : i32
    return %arg0, %c0_i32, %c0_i32_0 : i32, i32, i32
  }
  func.func @transform_6(%arg0: i32) -> (i32, i32, i32) {
    %c0_i32 = arith.constant 0 : i32
    %c0_i32_0 = arith.constant 0 : i32
    %c0_i32_1 = arith.constant 0 : i32
    return %arg0, %c0_i32, %c0_i32_0 : i32, i32, i32
  }
  func.func @transform_7(%arg0: i32) -> (i32, i32, i32) {
    %c0_i32 = arith.constant 0 : i32
    %c0_i32_0 = arith.constant 0 : i32
    %c0_i32_1 = arith.constant 0 : i32
    return %arg0, %c0_i32, %c0_i32_0 : i32, i32, i32
  }
  func.func @transform_8(%arg0: i32) -> (i32, i32, i32) {
    %c0_i32 = arith.constant 0 : i32
    %c0_i32_0 = arith.constant 0 : i32
    %c0_i32_1 = arith.constant 0 : i32
    return %arg0, %c0_i32, %c0_i32_0 : i32, i32, i32
  }
  func.func @transform_9(%arg0: i32) -> (i32, i32, i32) {
    %c0_i32 = arith.constant 0 : i32
    %c0_i32_0 = arith.constant 0 : i32
    %c0_i32_1 = arith.constant 0 : i32
    return %arg0, %c0_i32, %c0_i32_0 : i32, i32, i32
  }
}

module attributes {stable_mosaic.version = 11 : i64} {
  func.func @_gat_dual_layer_kernel(%arg0: i32, %arg1: memref<16x16xf32, #tpu.memory_space<vmem>>, %arg2: memref<16x16xf32, #tpu.memory_space<vmem>>, %arg3: memref<16x3xf32, #tpu.memory_space<vmem>>, %arg4: memref<1x16x1xi32, #tpu.memory_space<vmem>>, %arg5: memref<1x16x1xi32, #tpu.memory_space<vmem>>, %arg6: memref<1x1x16xi32, #tpu.memory_space<vmem>>, %arg7: memref<1x16x28xf32, #tpu.memory_space<vmem>>, %arg8: memref<1x16x22xf32, #tpu.memory_space<vmem>>, %arg9: memref<1x16x128xf32, #tpu.memory_space<vmem>>, %arg10: memref<1x16x128xf32, #tpu.memory_space<vmem>>) attributes {dimension_semantics = [#tpu.dimension_semantics<parallel>], iteration_bounds = array<i64: 2>, scalar_prefetch = 0 : i64, scratch_operands = 0 : i64, tpu.core_type = #tpu.core_type<tc>, window_params = [{pipeline_mode = #tpu.pipeline_mode<synchronous>, transform_indices = @transform_0, window_bounds = array<i64: 16, 16>}, {pipeline_mode = #tpu.pipeline_mode<synchronous>, transform_indices = @transform_1, window_bounds = array<i64: 16, 16>}, {pipeline_mode = #tpu.pipeline_mode<synchronous>, transform_indices = @transform_2, window_bounds = array<i64: 16, 3>}, {transform_indices = @transform_3, window_bounds = array<i64: 1, 16, 1>}, {transform_indices = @transform_4, window_bounds = array<i64: 1, 16, 1>}, {transform_indices = @transform_5, window_bounds = array<i64: 1, 1, 16>}, {transform_indices = @transform_6, window_bounds = array<i64: 1, 16, 28>}, {transform_indices = @transform_7, window_bounds = array<i64: 1, 16, 22>}, {transform_indices = @transform_8, window_bounds = array<i64: 1, 16, 128>}, {transform_indices = @transform_9, window_bounds = array<i64: 1, 16, 128>}]} {
    %c0 = arith.constant 0 : index
    %c0_0 = arith.constant 0 : index
    %0 = vector.load %arg1[%c0, %c0_0] : memref<16x16xf32, #tpu.memory_space<vmem>>, vector<16x16xf32>
    %c0_1 = arith.constant 0 : index
    %c0_2 = arith.constant 0 : index
    %c0_3 = arith.constant 0 : index
    %1 = vector.load %arg7[%c0_1, %c0_2, %c0_3] : memref<1x16x28xf32, #tpu.memory_space<vmem>>, vector<1x16x28xf32>
    %2 = vector.shape_cast %1 : vector<1x16x28xf32> to vector<16x28xf32>
    %cst = arith.constant dense<0.000000e+00> : vector<16x28xf32>
    %3 = tpu.matmul %0, %2, %cst {dimension_numbers = #tpu.dot_dimension_numbers<[1], [0], [0], [1], [0, 0, 1, 1], [], []>} : vector<16x16xf32>, vector<16x28xf32>, vector<16x28xf32> -> vector<16x28xf32>
    %c0_4 = arith.constant 0 : index
    %c0_5 = arith.constant 0 : index
    %4 = vector.load %arg2[%c0_4, %c0_5] : memref<16x16xf32, #tpu.memory_space<vmem>>, vector<16x16xf32>
    %c0_6 = arith.constant 0 : index
    %c0_7 = arith.constant 0 : index
    %c0_8 = arith.constant 0 : index
    %5 = vector.load %arg8[%c0_6, %c0_7, %c0_8] : memref<1x16x22xf32, #tpu.memory_space<vmem>>, vector<1x16x22xf32>
    %6 = vector.shape_cast %5 : vector<1x16x22xf32> to vector<16x22xf32>
    %cst_9 = arith.constant dense<0.000000e+00> : vector<16x22xf32>
    %7 = tpu.matmul %4, %6, %cst_9 {dimension_numbers = #tpu.dot_dimension_numbers<[1], [0], [0], [1], [0, 0, 1, 1], [], []>} : vector<16x16xf32>, vector<16x22xf32>, vector<16x22xf32> -> vector<16x22xf32>
    %8 = vector.extract_strided_slice %3 {offsets = [0, 0], sizes = [16, 16], strides = [1, 1]} : vector<16x28xf32> to vector<16x16xf32>
    %9 = vector.extract_strided_slice %3 {offsets = [0, 16], sizes = [16, 6], strides = [1, 1]} : vector<16x28xf32> to vector<16x6xf32>
    %10 = vector.extract_strided_slice %3 {offsets = [0, 22], sizes = [16, 6], strides = [1, 1]} : vector<16x28xf32> to vector<16x6xf32>
    %11 = vector.extract_strided_slice %7 {offsets = [0, 0], sizes = [16, 16], strides = [1, 1]} : vector<16x22xf32> to vector<16x16xf32>
    %12 = vector.extract_strided_slice %7 {offsets = [0, 16], sizes = [16, 6], strides = [1, 1]} : vector<16x22xf32> to vector<16x6xf32>
    %13 = tpu.iota {dimensions = array<i32: 1>} : vector<16x16xi32>
    %c0_10 = arith.constant 0 : index
    %c0_11 = arith.constant 0 : index
    %c0_12 = arith.constant 0 : index
    %14 = vector.load %arg4[%c0_10, %c0_11, %c0_12] : memref<1x16x1xi32, #tpu.memory_space<vmem>>, vector<1x16x1xi32>
    %15 = vector.shape_cast %14 : vector<1x16x1xi32> to vector<16x1xi32>
    %16 = vector.broadcast %15 : vector<16x1xi32> to vector<16x16xi32>
    %17 = arith.cmpi eq, %13, %16 : vector<16x16xi32>
    %18 = arith.extui %17 : vector<16x16xi1> to vector<16x16xi32>
    %19 = arith.sitofp %18 : vector<16x16xi32> to vector<16x16xf32>
    %c0_13 = arith.constant 0 : index
    %c0_14 = arith.constant 0 : index
    %c0_15 = arith.constant 0 : index
    %20 = vector.load %arg5[%c0_13, %c0_14, %c0_15] : memref<1x16x1xi32, #tpu.memory_space<vmem>>, vector<1x16x1xi32>
    %21 = vector.shape_cast %20 : vector<1x16x1xi32> to vector<16x1xi32>
    %22 = vector.broadcast %21 : vector<16x1xi32> to vector<16x16xi32>
    %23 = arith.cmpi eq, %13, %22 : vector<16x16xi32>
    %24 = arith.extui %23 : vector<16x16xi1> to vector<16x16xi32>
    %25 = arith.sitofp %24 : vector<16x16xi32> to vector<16x16xf32>
    %26 = tpu.iota {dimensions = array<i32: 0>} : vector<16x16xi32>
    %c0_16 = arith.constant 0 : index
    %c0_17 = arith.constant 0 : index
    %c0_18 = arith.constant 0 : index
    %27 = vector.load %arg6[%c0_16, %c0_17, %c0_18] : memref<1x1x16xi32, #tpu.memory_space<vmem>>, vector<1x1x16xi32>
    %28 = vector.shape_cast %27 : vector<1x1x16xi32> to vector<1x16xi32>
    %29 = vector.broadcast %28 : vector<1x16xi32> to vector<16x16xi32>
    %30 = arith.cmpi eq, %26, %29 : vector<16x16xi32>
    %31 = arith.extui %30 : vector<16x16xi1> to vector<16x16xi32>
    %32 = arith.sitofp %31 : vector<16x16xi32> to vector<16x16xf32>
    %33 = tpu.iota {dimensions = array<i32: 0>} : vector<6x2xi32>
    %34 = tpu.iota {dimensions = array<i32: 1>} : vector<6x2xi32>
    %c3_i32 = arith.constant 3 : i32
    %35 = vector.broadcast %c3_i32 : i32 to vector<6x2xi32>
    %36 = arith.muli %34, %35 : vector<6x2xi32>
    %37 = arith.cmpi sge, %33, %36 : vector<6x2xi32>
    %c3_i32_19 = arith.constant 3 : i32
    %38 = vector.broadcast %c3_i32_19 : i32 to vector<6x2xi32>
    %39 = arith.muli %34, %38 : vector<6x2xi32>
    %c3_i32_20 = arith.constant 3 : i32
    %40 = vector.broadcast %c3_i32_20 : i32 to vector<6x2xi32>
    %41 = arith.addi %39, %40 : vector<6x2xi32>
    %42 = arith.cmpi slt, %33, %41 : vector<6x2xi32>
    %43 = arith.andi %37, %42 : vector<6x2xi1>
    %44 = arith.extui %43 : vector<6x2xi1> to vector<6x2xi32>
    %45 = arith.sitofp %44 : vector<6x2xi32> to vector<6x2xf32>
    %46 = tpu.iota {dimensions = array<i32: 0>} : vector<2x16xi32>
    %47 = tpu.iota {dimensions = array<i32: 1>} : vector<2x16xi32>
    %c8_i32 = arith.constant 8 : i32
    %48 = vector.broadcast %c8_i32 : i32 to vector<2x16xi32>
    %49 = arith.muli %46, %48 : vector<2x16xi32>
    %50 = arith.cmpi sge, %47, %49 : vector<2x16xi32>
    %c8_i32_21 = arith.constant 8 : i32
    %51 = vector.broadcast %c8_i32_21 : i32 to vector<2x16xi32>
    %52 = arith.muli %46, %51 : vector<2x16xi32>
    %c8_i32_22 = arith.constant 8 : i32
    %53 = vector.broadcast %c8_i32_22 : i32 to vector<2x16xi32>
    %54 = arith.addi %52, %53 : vector<2x16xi32>
    %55 = arith.cmpi slt, %47, %54 : vector<2x16xi32>
    %56 = arith.andi %50, %55 : vector<2x16xi1>
    %57 = arith.extui %56 : vector<2x16xi1> to vector<2x16xi32>
    %58 = arith.sitofp %57 : vector<2x16xi32> to vector<2x16xf32>
    %cst_23 = arith.constant dense<0.000000e+00> : vector<16x6xf32>
    %59 = tpu.matmul %19, %9, %cst_23 {dimension_numbers = #tpu.dot_dimension_numbers<[1], [0], [0], [1], [0, 0, 1, 1], [], []>} : vector<16x16xf32>, vector<16x6xf32>, vector<16x6xf32> -> vector<16x6xf32>
    %cst_24 = arith.constant dense<0.000000e+00> : vector<16x6xf32>
    %60 = tpu.matmul %25, %10, %cst_24 {dimension_numbers = #tpu.dot_dimension_numbers<[1], [0], [0], [1], [0, 0, 1, 1], [], []>} : vector<16x16xf32>, vector<16x6xf32>, vector<16x6xf32> -> vector<16x6xf32>
    %61 = arith.addf %59, %60 : vector<16x6xf32>
    %62 = arith.addf %61, %12 : vector<16x6xf32>
    %c0_25 = arith.constant 0 : index
    %c0_26 = arith.constant 0 : index
    %63 = vector.load %arg3[%c0_25, %c0_26] : memref<16x3xf32, #tpu.memory_space<vmem>>, vector<16x3xf32>
    %64 = tpu.concatenate %63, %63 in 1 : vector<16x3xf32>, vector<16x3xf32> -> vector<16x6xf32>
    %65 = arith.mulf %62, %64 : vector<16x6xf32>
    %cst_27 = arith.constant dense<0.000000e+00> : vector<16x2xf32>
    %66 = tpu.matmul %65, %45, %cst_27 {dimension_numbers = #tpu.dot_dimension_numbers<[1], [0], [0], [1], [0, 0, 1, 1], [], []>} : vector<16x6xf32>, vector<6x2xf32>, vector<16x2xf32> -> vector<16x2xf32>
    %cst_28 = arith.constant 0.000000e+00 : f32
    %67 = vector.broadcast %cst_28 : f32 to vector<16x2xf32>
    %68 = arith.cmpf oge, %66, %67 : vector<16x2xf32>
    %cst_29 = arith.constant 2.000000e-01 : f32
    %69 = vector.broadcast %cst_29 : f32 to vector<16x2xf32>
    %70 = arith.mulf %69, %66 : vector<16x2xf32>
    %71 = arith.select %68, %66, %70 : vector<16x2xi1>, vector<16x2xf32>
    %cst_30 = arith.constant dense<0xFF800000> : vector<2xf32>
    %72 = vector.multi_reduction <maximumf>, %71, %cst_30 [0] : vector<16x2xf32> to vector<2xf32>
    %73 = vector.shape_cast %72 : vector<2xf32> to vector<1x2xf32>
    %74 = vector.broadcast %73 : vector<1x2xf32> to vector<16x2xf32>
    %75 = arith.subf %71, %74 : vector<16x2xf32>
    %76 = math.exp %75 : vector<16x2xf32>
    %cst_31 = arith.constant dense<0.000000e+00> : vector<16x2xf32>
    %77 = tpu.matmul %32, %76, %cst_31 {dimension_numbers = #tpu.dot_dimension_numbers<[1], [0], [0], [1], [0, 0, 1, 1], [], []>} : vector<16x16xf32>, vector<16x2xf32>, vector<16x2xf32> -> vector<16x2xf32>
    %cst_32 = arith.constant 0.000000e+00 : f32
    %78 = vector.broadcast %cst_32 : f32 to vector<16x2xf32>
    %79 = arith.cmpf ogt, %77, %78 : vector<16x2xf32>
    %cst_33 = arith.constant 1.000000e+00 : f32
    %80 = vector.broadcast %cst_33 : f32 to vector<16x2xf32>
    %81 = arith.divf %80, %77 : vector<16x2xf32>
    %cst_34 = arith.constant 0.000000e+00 : f32
    %82 = vector.broadcast %cst_34 : f32 to vector<16x2xf32>
    %83 = arith.select %79, %81, %82 : vector<16x2xi1>, vector<16x2xf32>
    %cst_35 = arith.constant dense<0.000000e+00> : vector<16x16xf32>
    %84 = tpu.matmul %19, %8, %cst_35 {dimension_numbers = #tpu.dot_dimension_numbers<[1], [0], [0], [1], [0, 0, 1, 1], [], []>} : vector<16x16xf32>, vector<16x16xf32>, vector<16x16xf32> -> vector<16x16xf32>
    %cst_36 = arith.constant dense<0.000000e+00> : vector<16x16xf32>
    %85 = tpu.matmul %76, %58, %cst_36 {dimension_numbers = #tpu.dot_dimension_numbers<[1], [0], [0], [1], [0, 0, 1, 1], [], []>} : vector<16x2xf32>, vector<2x16xf32>, vector<16x16xf32> -> vector<16x16xf32>
    %86 = arith.mulf %84, %85 : vector<16x16xf32>
    %cst_37 = arith.constant dense<0.000000e+00> : vector<16x16xf32>
    %87 = tpu.matmul %32, %86, %cst_37 {dimension_numbers = #tpu.dot_dimension_numbers<[1], [0], [0], [1], [0, 0, 1, 1], [], []>} : vector<16x16xf32>, vector<16x16xf32>, vector<16x16xf32> -> vector<16x16xf32>
    %cst_38 = arith.constant dense<0.000000e+00> : vector<16x16xf32>
    %88 = tpu.matmul %83, %58, %cst_38 {dimension_numbers = #tpu.dot_dimension_numbers<[1], [0], [0], [1], [0, 0, 1, 1], [], []>} : vector<16x2xf32>, vector<2x16xf32>, vector<16x16xf32> -> vector<16x16xf32>
    %89 = arith.mulf %87, %88 : vector<16x16xf32>
    %cst_39 = arith.constant dense<0.000000e+00> : vector<16x16xf32>
    %90 = tpu.matmul %19, %89, %cst_39 {dimension_numbers = #tpu.dot_dimension_numbers<[1], [0], [0], [1], [0, 0, 1, 1], [], []>} : vector<16x16xf32>, vector<16x16xf32>, vector<16x16xf32> -> vector<16x16xf32>
    %91 = arith.addf %11, %90 : vector<16x16xf32>
    %cst_40 = arith.constant dense<0.000000e+00> : vector<16x16xf32>
    %92 = tpu.matmul %25, %89, %cst_40 {dimension_numbers = #tpu.dot_dimension_numbers<[1], [0], [0], [1], [0, 0, 1, 1], [], []>} : vector<16x16xf32>, vector<16x16xf32>, vector<16x16xf32> -> vector<16x16xf32>
    %93 = arith.addf %91, %92 : vector<16x16xf32>
    %cst_41 = arith.constant 0.333333343 : f32
    %94 = vector.broadcast %cst_41 : f32 to vector<16x16xf32>
    %95 = arith.mulf %93, %94 : vector<16x16xf32>
    %96 = vector.extract_strided_slice %89 {offsets = [0, 0], sizes = [16, 8], strides = [1, 1]} : vector<16x16xf32> to vector<16x8xf32>
    %97 = vector.extract_strided_slice %89 {offsets = [0, 8], sizes = [16, 8], strides = [1, 1]} : vector<16x16xf32> to vector<16x8xf32>
    %98 = arith.addf %96, %97 : vector<16x8xf32>
    %cst_42 = arith.constant 5.000000e-01 : f32
    %99 = vector.broadcast %cst_42 : f32 to vector<16x8xf32>
    %100 = arith.mulf %98, %99 : vector<16x8xf32>
    %cst_43 = arith.constant 5.000000e-01 : f32
    %101 = vector.broadcast %cst_43 : f32 to vector<16x8xf32>
    %102 = arith.mulf %101, %100 : vector<16x8xf32>
    %103 = math.tanh %102 : vector<16x8xf32>
    %cst_44 = arith.constant 1.000000e+00 : f32
    %104 = vector.broadcast %cst_44 : f32 to vector<16x8xf32>
    %105 = arith.addf %103, %104 : vector<16x8xf32>
    %cst_45 = arith.constant 5.000000e-01 : f32
    %106 = vector.broadcast %cst_45 : f32 to vector<16x8xf32>
    %107 = arith.mulf %106, %105 : vector<16x8xf32>
    %cst_46 = arith.constant 0.000000e+00 : f32
    %108 = vector.broadcast %cst_46 : f32 to vector<16x120xf32>
    %109 = tpu.concatenate %107, %108 in 1 : vector<16x8xf32>, vector<16x120xf32> -> vector<16x128xf32>
    %c0_47 = arith.constant 0 : index
    %c0_48 = arith.constant 0 : index
    %c0_49 = arith.constant 0 : index
    %110 = vector.load %arg9[%c0_47, %c0_48, %c0_49] : memref<1x16x128xf32, #tpu.memory_space<vmem>>, vector<1x16x128xf32>
    %111 = vector.shape_cast %110 : vector<1x16x128xf32> to vector<16x128xf32>
    %112 = vector.shape_cast %109 : vector<16x128xf32> to vector<1x16x128xf32>
    tpu.vector_store %arg9[%c0_47, %c0_48, %c0_49], %112 {strides = array<i32>} : memref<1x16x128xf32, #tpu.memory_space<vmem>>, vector<1x16x128xf32>,
    %113 = vector.extract_strided_slice %95 {offsets = [0, 0], sizes = [16, 8], strides = [1, 1]} : vector<16x16xf32> to vector<16x8xf32>
    %114 = vector.extract_strided_slice %95 {offsets = [0, 8], sizes = [16, 8], strides = [1, 1]} : vector<16x16xf32> to vector<16x8xf32>
    %115 = arith.addf %113, %114 : vector<16x8xf32>
    %cst_50 = arith.constant 5.000000e-01 : f32
    %116 = vector.broadcast %cst_50 : f32 to vector<16x8xf32>
    %117 = arith.mulf %115, %116 : vector<16x8xf32>
    %cst_51 = arith.constant 5.000000e-01 : f32
    %118 = vector.broadcast %cst_51 : f32 to vector<16x8xf32>
    %119 = arith.mulf %118, %117 : vector<16x8xf32>
    %120 = math.tanh %119 : vector<16x8xf32>
    %cst_52 = arith.constant 1.000000e+00 : f32
    %121 = vector.broadcast %cst_52 : f32 to vector<16x8xf32>
    %122 = arith.addf %120, %121 : vector<16x8xf32>
    %cst_53 = arith.constant 5.000000e-01 : f32
    %123 = vector.broadcast %cst_53 : f32 to vector<16x8xf32>
    %124 = arith.mulf %123, %122 : vector<16x8xf32>
    %cst_54 = arith.constant 0.000000e+00 : f32
    %125 = vector.broadcast %cst_54 : f32 to vector<16x120xf32>
    %126 = tpu.concatenate %124, %125 in 1 : vector<16x8xf32>, vector<16x120xf32> -> vector<16x128xf32>
    %c0_55 = arith.constant 0 : index
    %c0_56 = arith.constant 0 : index
    %c0_57 = arith.constant 0 : index
    %127 = vector.load %arg10[%c0_55, %c0_56, %c0_57] : memref<1x16x128xf32, #tpu.memory_space<vmem>>, vector<1x16x128xf32>
    %128 = vector.shape_cast %127 : vector<1x16x128xf32> to vector<16x128xf32>
    %129 = vector.shape_cast %126 : vector<16x128xf32> to vector<1x16x128xf32>
    tpu.vector_store %arg10[%c0_55, %c0_56, %c0_57], %129 {strides = array<i32>} : memref<1x16x128xf32, #tpu.memory_space<vmem>>, vector<1x16x128xf32>,
    return
  }
  func.func @transform_0(%arg0: i32) -> (i32, i32) {
    %c0_i32 = arith.constant 0 : i32
    %c0_i32_0 = arith.constant 0 : i32
    %c0_i32_1 = arith.constant 0 : i32
    return %c0_i32, %c0_i32_0 : i32, i32
  }
  func.func @transform_1(%arg0: i32) -> (i32, i32) {
    %c0_i32 = arith.constant 0 : i32
    %c0_i32_0 = arith.constant 0 : i32
    %c0_i32_1 = arith.constant 0 : i32
    return %c0_i32, %c0_i32_0 : i32, i32
  }
  func.func @transform_2(%arg0: i32) -> (i32, i32) {
    %c0_i32 = arith.constant 0 : i32
    %c0_i32_0 = arith.constant 0 : i32
    %c0_i32_1 = arith.constant 0 : i32
    return %c0_i32, %c0_i32_0 : i32, i32
  }
  func.func @transform_3(%arg0: i32) -> (i32, i32, i32) {
    %c0_i32 = arith.constant 0 : i32
    %c0_i32_0 = arith.constant 0 : i32
    %c0_i32_1 = arith.constant 0 : i32
    return %arg0, %c0_i32, %c0_i32_0 : i32, i32, i32
  }
  func.func @transform_4(%arg0: i32) -> (i32, i32, i32) {
    %c0_i32 = arith.constant 0 : i32
    %c0_i32_0 = arith.constant 0 : i32
    %c0_i32_1 = arith.constant 0 : i32
    return %arg0, %c0_i32, %c0_i32_0 : i32, i32, i32
  }
  func.func @transform_5(%arg0: i32) -> (i32, i32, i32) {
    %c0_i32 = arith.constant 0 : i32
    %c0_i32_0 = arith.constant 0 : i32
    %c0_i32_1 = arith.constant 0 : i32
    return %arg0, %c0_i32, %c0_i32_0 : i32, i32, i32
  }
  func.func @transform_6(%arg0: i32) -> (i32, i32, i32) {
    %c0_i32 = arith.constant 0 : i32
    %c0_i32_0 = arith.constant 0 : i32
    %c0_i32_1 = arith.constant 0 : i32
    return %arg0, %c0_i32, %c0_i32_0 : i32, i32, i32
  }
  func.func @transform_7(%arg0: i32) -> (i32, i32, i32) {
    %c0_i32 = arith.constant 0 : i32
    %c0_i32_0 = arith.constant 0 : i32
    %c0_i32_1 = arith.constant 0 : i32
    return %arg0, %c0_i32, %c0_i32_0 : i32, i32, i32
  }
  func.func @transform_8(%arg0: i32) -> (i32, i32, i32) {
    %c0_i32 = arith.constant 0 : i32
    %c0_i32_0 = arith.constant 0 : i32
    %c0_i32_1 = arith.constant 0 : i32
    return %arg0, %c0_i32, %c0_i32_0 : i32, i32, i32
  }
  func.func @transform_9(%arg0: i32) -> (i32, i32, i32) {
    %c0_i32 = arith.constant 0 : i32
    %c0_i32_0 = arith.constant 0 : i32
    %c0_i32_1 = arith.constant 0 : i32
    return %arg0, %c0_i32, %c0_i32_0 : i32, i32, i32
  }
}

module attributes {stable_mosaic.version = 11 : i64} {
  func.func @_gru_predictor_pair_kernel(%arg0: i32, %arg1: memref<16x8xf32, #tpu.memory_space<vmem>>, %arg2: memref<16x8xf32, #tpu.memory_space<vmem>>, %arg3: memref<16x16xf32, #tpu.memory_space<vmem>>, %arg4: memref<8x48xf32, #tpu.memory_space<vmem>>, %arg5: memref<16x48xf32, #tpu.memory_space<vmem>>, %arg6: memref<1x48xf32, #tpu.memory_space<vmem>>, %arg7: memref<1x48xf32, #tpu.memory_space<vmem>>, %arg8: memref<8x48xf32, #tpu.memory_space<vmem>>, %arg9: memref<16x48xf32, #tpu.memory_space<vmem>>, %arg10: memref<1x48xf32, #tpu.memory_space<vmem>>, %arg11: memref<1x48xf32, #tpu.memory_space<vmem>>, %arg12: memref<16x1xf32, #tpu.memory_space<vmem>>, %arg13: memref<1x1xf32, #tpu.memory_space<vmem>>, %arg14: memref<16x1xf32, #tpu.memory_space<vmem>>, %arg15: memref<1x1xf32, #tpu.memory_space<vmem>>, %arg16: memref<16x128xf32, #tpu.memory_space<vmem>>) attributes {dimension_semantics = [#tpu.dimension_semantics<arbitrary>], iteration_bounds = array<i64: 1>, scalar_prefetch = 0 : i64, scratch_operands = 0 : i64, tpu.core_type = #tpu.core_type<tc>, window_params = [{pipeline_mode = #tpu.pipeline_mode<synchronous>, transform_indices = @transform_0, window_bounds = array<i64: 16, 8>}, {pipeline_mode = #tpu.pipeline_mode<synchronous>, transform_indices = @transform_1, window_bounds = array<i64: 16, 8>}, {pipeline_mode = #tpu.pipeline_mode<synchronous>, transform_indices = @transform_2, window_bounds = array<i64: 16, 16>}, {pipeline_mode = #tpu.pipeline_mode<synchronous>, transform_indices = @transform_3, window_bounds = array<i64: 8, 48>}, {pipeline_mode = #tpu.pipeline_mode<synchronous>, transform_indices = @transform_4, window_bounds = array<i64: 16, 48>}, {pipeline_mode = #tpu.pipeline_mode<synchronous>, transform_indices = @transform_5, window_bounds = array<i64: 1, 48>}, {pipeline_mode = #tpu.pipeline_mode<synchronous>, transform_indices = @transform_6, window_bounds = array<i64: 1, 48>}, {pipeline_mode = #tpu.pipeline_mode<synchronous>, transform_indices = @transform_7, window_bounds = array<i64: 8, 48>}, {pipeline_mode = #tpu.pipeline_mode<synchronous>, transform_indices = @transform_8, window_bounds = array<i64: 16, 48>}, {pipeline_mode = #tpu.pipeline_mode<synchronous>, transform_indices = @transform_9, window_bounds = array<i64: 1, 48>}, {pipeline_mode = #tpu.pipeline_mode<synchronous>, transform_indices = @transform_10, window_bounds = array<i64: 1, 48>}, {pipeline_mode = #tpu.pipeline_mode<synchronous>, transform_indices = @transform_11, window_bounds = array<i64: 16, 1>}, {pipeline_mode = #tpu.pipeline_mode<synchronous>, transform_indices = @transform_12, window_bounds = array<i64: 1, 1>}, {pipeline_mode = #tpu.pipeline_mode<synchronous>, transform_indices = @transform_13, window_bounds = array<i64: 16, 1>}, {pipeline_mode = #tpu.pipeline_mode<synchronous>, transform_indices = @transform_14, window_bounds = array<i64: 1, 1>}, {pipeline_mode = #tpu.pipeline_mode<synchronous>, transform_indices = @transform_15, window_bounds = array<i64: 16, 128>}]} {
    %c0 = arith.constant 0 : index
    %c0_0 = arith.constant 0 : index
    %0 = vector.load %arg3[%c0, %c0_0] : memref<16x16xf32, #tpu.memory_space<vmem>>, vector<16x16xf32>
    %c0_1 = arith.constant 0 : index
    %c0_2 = arith.constant 0 : index
    %1 = vector.load %arg1[%c0_1, %c0_2] : memref<16x8xf32, #tpu.memory_space<vmem>>, vector<16x8xf32>
    %c0_3 = arith.constant 0 : index
    %c0_4 = arith.constant 0 : index
    %2 = vector.load %arg4[%c0_3, %c0_4] : memref<8x48xf32, #tpu.memory_space<vmem>>, vector<8x48xf32>
    %c0_5 = arith.constant 0 : index
    %c0_6 = arith.constant 0 : index
    %3 = vector.load %arg5[%c0_5, %c0_6] : memref<16x48xf32, #tpu.memory_space<vmem>>, vector<16x48xf32>
    %c0_7 = arith.constant 0 : index
    %c0_8 = arith.constant 0 : index
    %4 = vector.load %arg6[%c0_7, %c0_8] : memref<1x48xf32, #tpu.memory_space<vmem>>, vector<1x48xf32>
    %c0_9 = arith.constant 0 : index
    %c0_10 = arith.constant 0 : index
    %5 = vector.load %arg7[%c0_9, %c0_10] : memref<1x48xf32, #tpu.memory_space<vmem>>, vector<1x48xf32>
    %cst = arith.constant dense<0.000000e+00> : vector<16x48xf32>
    %6 = tpu.matmul %1, %2, %cst {dimension_numbers = #tpu.dot_dimension_numbers<[1], [0], [0], [1], [0, 0, 1, 1], [], []>} : vector<16x8xf32>, vector<8x48xf32>, vector<16x48xf32> -> vector<16x48xf32>
    %7 = vector.broadcast %4 : vector<1x48xf32> to vector<16x48xf32>
    %8 = arith.addf %6, %7 : vector<16x48xf32>
    %cst_11 = arith.constant dense<0.000000e+00> : vector<16x48xf32>
    %9 = tpu.matmul %0, %3, %cst_11 {dimension_numbers = #tpu.dot_dimension_numbers<[1], [0], [0], [1], [0, 0, 1, 1], [], []>} : vector<16x16xf32>, vector<16x48xf32>, vector<16x48xf32> -> vector<16x48xf32>
    %10 = vector.broadcast %5 : vector<1x48xf32> to vector<16x48xf32>
    %11 = arith.addf %9, %10 : vector<16x48xf32>
    %12 = vector.extract_strided_slice %8 {offsets = [0, 0], sizes = [16, 16], strides = [1, 1]} : vector<16x48xf32> to vector<16x16xf32>
    %13 = vector.extract_strided_slice %11 {offsets = [0, 0], sizes = [16, 16], strides = [1, 1]} : vector<16x48xf32> to vector<16x16xf32>
    %14 = arith.addf %12, %13 : vector<16x16xf32>
    %cst_12 = arith.constant 5.000000e-01 : f32
    %15 = vector.broadcast %cst_12 : f32 to vector<16x16xf32>
    %16 = arith.mulf %15, %14 : vector<16x16xf32>
    %17 = math.tanh %16 : vector<16x16xf32>
    %cst_13 = arith.constant 1.000000e+00 : f32
    %18 = vector.broadcast %cst_13 : f32 to vector<16x16xf32>
    %19 = arith.addf %17, %18 : vector<16x16xf32>
    %cst_14 = arith.constant 5.000000e-01 : f32
    %20 = vector.broadcast %cst_14 : f32 to vector<16x16xf32>
    %21 = arith.mulf %20, %19 : vector<16x16xf32>
    %22 = vector.extract_strided_slice %8 {offsets = [0, 16], sizes = [16, 16], strides = [1, 1]} : vector<16x48xf32> to vector<16x16xf32>
    %23 = vector.extract_strided_slice %11 {offsets = [0, 16], sizes = [16, 16], strides = [1, 1]} : vector<16x48xf32> to vector<16x16xf32>
    %24 = arith.addf %22, %23 : vector<16x16xf32>
    %cst_15 = arith.constant 5.000000e-01 : f32
    %25 = vector.broadcast %cst_15 : f32 to vector<16x16xf32>
    %26 = arith.mulf %25, %24 : vector<16x16xf32>
    %27 = math.tanh %26 : vector<16x16xf32>
    %cst_16 = arith.constant 1.000000e+00 : f32
    %28 = vector.broadcast %cst_16 : f32 to vector<16x16xf32>
    %29 = arith.addf %27, %28 : vector<16x16xf32>
    %cst_17 = arith.constant 5.000000e-01 : f32
    %30 = vector.broadcast %cst_17 : f32 to vector<16x16xf32>
    %31 = arith.mulf %30, %29 : vector<16x16xf32>
    %32 = vector.extract_strided_slice %8 {offsets = [0, 32], sizes = [16, 16], strides = [1, 1]} : vector<16x48xf32> to vector<16x16xf32>
    %33 = vector.extract_strided_slice %11 {offsets = [0, 32], sizes = [16, 16], strides = [1, 1]} : vector<16x48xf32> to vector<16x16xf32>
    %34 = arith.mulf %21, %33 : vector<16x16xf32>
    %35 = arith.addf %32, %34 : vector<16x16xf32>
    %36 = math.tanh %35 : vector<16x16xf32>
    %cst_18 = arith.constant 1.000000e+00 : f32
    %37 = vector.broadcast %cst_18 : f32 to vector<16x16xf32>
    %38 = arith.subf %37, %31 : vector<16x16xf32>
    %39 = arith.mulf %38, %36 : vector<16x16xf32>
    %40 = arith.mulf %31, %0 : vector<16x16xf32>
    %41 = arith.addf %39, %40 : vector<16x16xf32>
    %c0_19 = arith.constant 0 : index
    %c0_20 = arith.constant 0 : index
    %42 = vector.load %arg2[%c0_19, %c0_20] : memref<16x8xf32, #tpu.memory_space<vmem>>, vector<16x8xf32>
    %c0_21 = arith.constant 0 : index
    %c0_22 = arith.constant 0 : index
    %43 = vector.load %arg8[%c0_21, %c0_22] : memref<8x48xf32, #tpu.memory_space<vmem>>, vector<8x48xf32>
    %c0_23 = arith.constant 0 : index
    %c0_24 = arith.constant 0 : index
    %44 = vector.load %arg9[%c0_23, %c0_24] : memref<16x48xf32, #tpu.memory_space<vmem>>, vector<16x48xf32>
    %c0_25 = arith.constant 0 : index
    %c0_26 = arith.constant 0 : index
    %45 = vector.load %arg10[%c0_25, %c0_26] : memref<1x48xf32, #tpu.memory_space<vmem>>, vector<1x48xf32>
    %c0_27 = arith.constant 0 : index
    %c0_28 = arith.constant 0 : index
    %46 = vector.load %arg11[%c0_27, %c0_28] : memref<1x48xf32, #tpu.memory_space<vmem>>, vector<1x48xf32>
    %cst_29 = arith.constant dense<0.000000e+00> : vector<16x48xf32>
    %47 = tpu.matmul %42, %43, %cst_29 {dimension_numbers = #tpu.dot_dimension_numbers<[1], [0], [0], [1], [0, 0, 1, 1], [], []>} : vector<16x8xf32>, vector<8x48xf32>, vector<16x48xf32> -> vector<16x48xf32>
    %48 = vector.broadcast %45 : vector<1x48xf32> to vector<16x48xf32>
    %49 = arith.addf %47, %48 : vector<16x48xf32>
    %cst_30 = arith.constant dense<0.000000e+00> : vector<16x48xf32>
    %50 = tpu.matmul %0, %44, %cst_30 {dimension_numbers = #tpu.dot_dimension_numbers<[1], [0], [0], [1], [0, 0, 1, 1], [], []>} : vector<16x16xf32>, vector<16x48xf32>, vector<16x48xf32> -> vector<16x48xf32>
    %51 = vector.broadcast %46 : vector<1x48xf32> to vector<16x48xf32>
    %52 = arith.addf %50, %51 : vector<16x48xf32>
    %53 = vector.extract_strided_slice %49 {offsets = [0, 0], sizes = [16, 16], strides = [1, 1]} : vector<16x48xf32> to vector<16x16xf32>
    %54 = vector.extract_strided_slice %52 {offsets = [0, 0], sizes = [16, 16], strides = [1, 1]} : vector<16x48xf32> to vector<16x16xf32>
    %55 = arith.addf %53, %54 : vector<16x16xf32>
    %cst_31 = arith.constant 5.000000e-01 : f32
    %56 = vector.broadcast %cst_31 : f32 to vector<16x16xf32>
    %57 = arith.mulf %56, %55 : vector<16x16xf32>
    %58 = math.tanh %57 : vector<16x16xf32>
    %cst_32 = arith.constant 1.000000e+00 : f32
    %59 = vector.broadcast %cst_32 : f32 to vector<16x16xf32>
    %60 = arith.addf %58, %59 : vector<16x16xf32>
    %cst_33 = arith.constant 5.000000e-01 : f32
    %61 = vector.broadcast %cst_33 : f32 to vector<16x16xf32>
    %62 = arith.mulf %61, %60 : vector<16x16xf32>
    %63 = vector.extract_strided_slice %49 {offsets = [0, 16], sizes = [16, 16], strides = [1, 1]} : vector<16x48xf32> to vector<16x16xf32>
    %64 = vector.extract_strided_slice %52 {offsets = [0, 16], sizes = [16, 16], strides = [1, 1]} : vector<16x48xf32> to vector<16x16xf32>
    %65 = arith.addf %63, %64 : vector<16x16xf32>
    %cst_34 = arith.constant 5.000000e-01 : f32
    %66 = vector.broadcast %cst_34 : f32 to vector<16x16xf32>
    %67 = arith.mulf %66, %65 : vector<16x16xf32>
    %68 = math.tanh %67 : vector<16x16xf32>
    %cst_35 = arith.constant 1.000000e+00 : f32
    %69 = vector.broadcast %cst_35 : f32 to vector<16x16xf32>
    %70 = arith.addf %68, %69 : vector<16x16xf32>
    %cst_36 = arith.constant 5.000000e-01 : f32
    %71 = vector.broadcast %cst_36 : f32 to vector<16x16xf32>
    %72 = arith.mulf %71, %70 : vector<16x16xf32>
    %73 = vector.extract_strided_slice %49 {offsets = [0, 32], sizes = [16, 16], strides = [1, 1]} : vector<16x48xf32> to vector<16x16xf32>
    %74 = vector.extract_strided_slice %52 {offsets = [0, 32], sizes = [16, 16], strides = [1, 1]} : vector<16x48xf32> to vector<16x16xf32>
    %75 = arith.mulf %62, %74 : vector<16x16xf32>
    %76 = arith.addf %73, %75 : vector<16x16xf32>
    %77 = math.tanh %76 : vector<16x16xf32>
    %cst_37 = arith.constant 1.000000e+00 : f32
    %78 = vector.broadcast %cst_37 : f32 to vector<16x16xf32>
    %79 = arith.subf %78, %72 : vector<16x16xf32>
    %80 = arith.mulf %79, %77 : vector<16x16xf32>
    %81 = arith.mulf %72, %0 : vector<16x16xf32>
    %82 = arith.addf %80, %81 : vector<16x16xf32>
    %c0_38 = arith.constant 0 : index
    %c0_39 = arith.constant 0 : index
    %83 = vector.load %arg12[%c0_38, %c0_39] : memref<16x1xf32, #tpu.memory_space<vmem>>, vector<16x1xf32>
    %cst_40 = arith.constant dense<0.000000e+00> : vector<16x1xf32>
    %84 = tpu.matmul %41, %83, %cst_40 {dimension_numbers = #tpu.dot_dimension_numbers<[1], [0], [0], [1], [0, 0, 1, 1], [], []>} : vector<16x16xf32>, vector<16x1xf32>, vector<16x1xf32> -> vector<16x1xf32>
    %c0_41 = arith.constant 0 : index
    %c0_42 = arith.constant 0 : index
    %85 = vector.load %arg13[%c0_41, %c0_42] : memref<1x1xf32, #tpu.memory_space<vmem>>, vector<1x1xf32>
    %86 = vector.broadcast %85 : vector<1x1xf32> to vector<16x1xf32>
    %87 = arith.addf %84, %86 : vector<16x1xf32>
    %cst_43 = arith.constant 5.000000e-01 : f32
    %88 = vector.broadcast %cst_43 : f32 to vector<16x1xf32>
    %89 = arith.mulf %88, %87 : vector<16x1xf32>
    %90 = math.tanh %89 : vector<16x1xf32>
    %cst_44 = arith.constant 1.000000e+00 : f32
    %91 = vector.broadcast %cst_44 : f32 to vector<16x1xf32>
    %92 = arith.addf %90, %91 : vector<16x1xf32>
    %cst_45 = arith.constant 5.000000e-01 : f32
    %93 = vector.broadcast %cst_45 : f32 to vector<16x1xf32>
    %94 = arith.mulf %93, %92 : vector<16x1xf32>
    %c0_46 = arith.constant 0 : index
    %c0_47 = arith.constant 0 : index
    %95 = vector.load %arg14[%c0_46, %c0_47] : memref<16x1xf32, #tpu.memory_space<vmem>>, vector<16x1xf32>
    %cst_48 = arith.constant dense<0.000000e+00> : vector<16x1xf32>
    %96 = tpu.matmul %82, %95, %cst_48 {dimension_numbers = #tpu.dot_dimension_numbers<[1], [0], [0], [1], [0, 0, 1, 1], [], []>} : vector<16x16xf32>, vector<16x1xf32>, vector<16x1xf32> -> vector<16x1xf32>
    %c0_49 = arith.constant 0 : index
    %c0_50 = arith.constant 0 : index
    %97 = vector.load %arg15[%c0_49, %c0_50] : memref<1x1xf32, #tpu.memory_space<vmem>>, vector<1x1xf32>
    %98 = vector.broadcast %97 : vector<1x1xf32> to vector<16x1xf32>
    %99 = arith.addf %96, %98 : vector<16x1xf32>
    %cst_51 = arith.constant 0.000000e+00 : f32
    %100 = vector.broadcast %cst_51 : f32 to vector<16x1xf32>
    %101 = arith.maximumf %99, %100 : vector<16x1xf32>
    %cst_52 = arith.constant 0.000000e+00 : f32
    %102 = vector.broadcast %cst_52 : f32 to vector<16x94xf32>
    %103 = tpu.concatenate %41, %82, %94, %101, %102 in 1 : vector<16x16xf32>, vector<16x16xf32>, vector<16x1xf32>, vector<16x1xf32>, vector<16x94xf32> -> vector<16x128xf32>
    %c0_53 = arith.constant 0 : index
    %c0_54 = arith.constant 0 : index
    %104 = vector.load %arg16[%c0_53, %c0_54] : memref<16x128xf32, #tpu.memory_space<vmem>>, vector<16x128xf32>
    tpu.vector_store %arg16[%c0_53, %c0_54], %103 {strides = array<i32>} : memref<16x128xf32, #tpu.memory_space<vmem>>, vector<16x128xf32>,
    return
  }
  func.func @transform_0(%arg0: i32) -> (i32, i32) {
    %c0_i32 = arith.constant 0 : i32
    %c0_i32_0 = arith.constant 0 : i32
    %c0_i32_1 = arith.constant 0 : i32
    return %c0_i32, %c0_i32_0 : i32, i32
  }
  func.func @transform_1(%arg0: i32) -> (i32, i32) {
    %c0_i32 = arith.constant 0 : i32
    %c0_i32_0 = arith.constant 0 : i32
    %c0_i32_1 = arith.constant 0 : i32
    return %c0_i32, %c0_i32_0 : i32, i32
  }
  func.func @transform_2(%arg0: i32) -> (i32, i32) {
    %c0_i32 = arith.constant 0 : i32
    %c0_i32_0 = arith.constant 0 : i32
    %c0_i32_1 = arith.constant 0 : i32
    return %c0_i32, %c0_i32_0 : i32, i32
  }
  func.func @transform_3(%arg0: i32) -> (i32, i32) {
    %c0_i32 = arith.constant 0 : i32
    %c0_i32_0 = arith.constant 0 : i32
    %c0_i32_1 = arith.constant 0 : i32
    return %c0_i32, %c0_i32_0 : i32, i32
  }
  func.func @transform_4(%arg0: i32) -> (i32, i32) {
    %c0_i32 = arith.constant 0 : i32
    %c0_i32_0 = arith.constant 0 : i32
    %c0_i32_1 = arith.constant 0 : i32
    return %c0_i32, %c0_i32_0 : i32, i32
  }
  func.func @transform_5(%arg0: i32) -> (i32, i32) {
    %c0_i32 = arith.constant 0 : i32
    %c0_i32_0 = arith.constant 0 : i32
    %c0_i32_1 = arith.constant 0 : i32
    return %c0_i32, %c0_i32_0 : i32, i32
  }
  func.func @transform_6(%arg0: i32) -> (i32, i32) {
    %c0_i32 = arith.constant 0 : i32
    %c0_i32_0 = arith.constant 0 : i32
    %c0_i32_1 = arith.constant 0 : i32
    return %c0_i32, %c0_i32_0 : i32, i32
  }
  func.func @transform_7(%arg0: i32) -> (i32, i32) {
    %c0_i32 = arith.constant 0 : i32
    %c0_i32_0 = arith.constant 0 : i32
    %c0_i32_1 = arith.constant 0 : i32
    return %c0_i32, %c0_i32_0 : i32, i32
  }
  func.func @transform_8(%arg0: i32) -> (i32, i32) {
    %c0_i32 = arith.constant 0 : i32
    %c0_i32_0 = arith.constant 0 : i32
    %c0_i32_1 = arith.constant 0 : i32
    return %c0_i32, %c0_i32_0 : i32, i32
  }
  func.func @transform_9(%arg0: i32) -> (i32, i32) {
    %c0_i32 = arith.constant 0 : i32
    %c0_i32_0 = arith.constant 0 : i32
    %c0_i32_1 = arith.constant 0 : i32
    return %c0_i32, %c0_i32_0 : i32, i32
  }
  func.func @transform_10(%arg0: i32) -> (i32, i32) {
    %c0_i32 = arith.constant 0 : i32
    %c0_i32_0 = arith.constant 0 : i32
    %c0_i32_1 = arith.constant 0 : i32
    return %c0_i32, %c0_i32_0 : i32, i32
  }
  func.func @transform_11(%arg0: i32) -> (i32, i32) {
    %c0_i32 = arith.constant 0 : i32
    %c0_i32_0 = arith.constant 0 : i32
    %c0_i32_1 = arith.constant 0 : i32
    return %c0_i32, %c0_i32_0 : i32, i32
  }
  func.func @transform_12(%arg0: i32) -> (i32, i32) {
    %c0_i32 = arith.constant 0 : i32
    %c0_i32_0 = arith.constant 0 : i32
    %c0_i32_1 = arith.constant 0 : i32
    return %c0_i32, %c0_i32_0 : i32, i32
  }
  func.func @transform_13(%arg0: i32) -> (i32, i32) {
    %c0_i32 = arith.constant 0 : i32
    %c0_i32_0 = arith.constant 0 : i32
    %c0_i32_1 = arith.constant 0 : i32
    return %c0_i32, %c0_i32_0 : i32, i32
  }
  func.func @transform_14(%arg0: i32) -> (i32, i32) {
    %c0_i32 = arith.constant 0 : i32
    %c0_i32_0 = arith.constant 0 : i32
    %c0_i32_1 = arith.constant 0 : i32
    return %c0_i32, %c0_i32_0 : i32, i32
  }
  func.func @transform_15(%arg0: i32) -> (i32, i32) {
    %c0_i32 = arith.constant 0 : i32
    %c0_i32_0 = arith.constant 0 : i32
    %c0_i32_1 = arith.constant 0 : i32
    return %c0_i32, %c0_i32_0 : i32, i32
  }
}

</mosaic_0001>

<bundles_post_ra>
// kernel: _lambda_.5
= control target key start
LH: loop header
LB: loop body
LE: loop exit
PB: predicated region body
PF: predicated region fallthrough
CT: control target
= control target key end

     0   :  { %vm66_vm0 = vcmask 64512   ;;  %vm99_vm1 = vcmask 130048   ;;  %s467_s27 = smov 112   ;;  %s468_s20 = smov 33   ;;  %vm404_vm2 = vcmask 261120   ;;  %vm407_vm3 = vcmask 269312   ;;  %s663_s3 = inlined_call_operand.vmem [shape: f32[8,48], index: 3, kind: input, shape index: {}]   ;;  %s664_s7 = inlined_call_operand.vmem [shape: f32[8,48], index: 7, kind: input, shape index: {}]   ;;  %s665_s0 = inlined_call_operand.vmem [shape: f32[16,8], index: 0, kind: input, shape index: {}]   ;;  %s666_s4 = inlined_call_operand.vmem [shape: f32[16,48], index: 4, kind: input, shape index: {}]   ;;  %s667_s1 = inlined_call_operand.vmem [shape: f32[16,8], index: 1, kind: input, shape index: {}]   ;;  %s668_s8 = inlined_call_operand.vmem [shape: f32[16,48], index: 8, kind: input, shape index: {}]   ;;  %s669_s5 = inlined_call_operand.vmem [shape: f32[1,48], index: 5, kind: input, shape index: {}]   ;;  %s670_s9 = inlined_call_operand.vmem [shape: f32[1,48], index: 9, kind: input, shape index: {}]   ;;  %s671_s2 = inlined_call_operand.vmem [shape: f32[16,16], index: 2, kind: input, shape index: {}]   ;;  %s672_s6 = inlined_call_operand.vmem [shape: f32[1,48], index: 6, kind: input, shape index: {}]   ;;  %s673_s10 = inlined_call_operand.vmem [shape: f32[1,48], index: 10, kind: input, shape index: {}]   ;;  %s674_s11 = inlined_call_operand.vmem [shape: f32[16,1], index: 11, kind: input, shape index: {}]   ;;  %s675_s13 = inlined_call_operand.vmem [shape: f32[16,1], index: 13, kind: input, shape index: {}]   ;;  %s676_s12 = inlined_call_operand.<no memory space> [shape: f32[1,1], index: 12, kind: input, shape index: {}]   ;;  %s677_s14 = inlined_call_operand.<no memory space> [shape: f32[1,1], index: 14, kind: input, shape index: {}]   ;;  %s678_s15 = inlined_call_operand.vmem [shape: f32[16,128], index: 15, kind: output, shape index: {}]  }
   0x1   :  { %v58_v0 = vld [vmem:[%s663_s3] sm:$0xff]  ;;  %v57_v2 = vld [vmem:[%s665_s0 + $0x8] sm:$0xff]  ;;  %vm410_vm4 = vcmask 277504  }
   0x2   :  { %v185_v1 = vld [vmem:[%s664_s7] sm:$0xff]  ;;  %431 = vmatpush.msra.mxu1 %v58_v0  ;;  %v60_v3 = vld [vmem:[%s666_s4 + $0x8] sm:$0xff]  ;;  %88 = vmatpush.msra.mxu0 %v58_v0 }
   0x3   :  { %432 = vmatpush.msra.mxu3 %v185_v1  ;;  %v184_v4 = vld [vmem:[%s667_s1 + $0x8] sm:$0xff]  ;;  %420 = vmatmul.msk.f32.vlgmr.msra.gmra.mxu1 %vm66_vm0, %v57_v2  ;;  %v59_v6 = vld [vmem:[%s666_s4] sm:$0xff] }
   0x4   :  { %v187_v5 = vld [vmem:[%s668_s8 + $0x8] sm:$0xff]  ;;  %424 = vmatmul.msk.f32.vlgmr.msra.gmra.mxu3 %vm66_vm0, %v184_v4  ;;  %v186_v7 = vld [vmem:[%s668_s8] sm:$0xff]  ;;  %120 = vmatpush.msrb.mxu1 %v60_v3 }
   0x5   :  { %239 = vmatpush.msrb.mxu3 %v187_v5  ;;  %v56_v8 = vld [vmem:[%s665_s0] sm:$0xff]  ;;  %214 = vmatpush.msra.mxu2 %v185_v1  ;;  %v595_v11 = vld [vmem:[%s671_s2 + $0x8] sm:$0xff] }
   0x6   :  { %v183_v9 = vld [vmem:[%s667_s1] sm:$0xff]  ;;  %121 = vmatpush.msrb.mxu1 %v59_v6  ;;  %419 = vmatmul.msk.f32.vlgmr.msra.gmra.mxu0 %vm66_vm0, %v56_v8 }
   0x7   :  { %240 = vmatpush.msrb.mxu3 %v186_v7  ;;  %423 = vmatmul.msk.f32.vlgmr.msra.gmra.mxu2 %vm66_vm0, %v183_v9  ;;  %v586_v10 = vld [vmem:[%s671_s2] sm:$0xff]  ;;  %s464_s2 = smov 96  }
   0x8   :  { %v438_v12 = vld [vmem:[%s669_s5] ss:$0 sm:$0xff] }
   0x9   :  { %v440_v15 = vld [vmem:[%s672_s6] ss:$0 sm:$0xff] }
   0xa   :  { %v441_v19 = vld [vmem:[%s673_s10] ss:$0 sm:$0xff]  ;;  %s466_s10 = smov 16  }
   0xb   :  { %421 = vmatmul.msk.f32.vlgmr.msrb.gmra.mxu1 %vm99_vm1, %v586_v10  ;;  %v439_v30 = vld [vmem:[%s670_s9] ss:$0 sm:$0xff]  ;;  %s465_s9 = smov 32  }
   0xc   :  { %425 = vmatmul.msk.f32.vlgmr.msrb.gmra.mxu3 %vm99_vm1, %v586_v10 }
  0x13   :  { %422 = vmatmul.msk.f32.gmra.mxu1 %vm99_vm1, %v595_v11 }
  0x14   :  { %426 = vmatmul.msk.f32.gmra.mxu3 %vm99_vm1, %v595_v11 }
  0x80   :  { %v93_v13 = vpop.f32.mrf.mxu1 }
  0x81   :  { %v604_v14 = vadd.f32 %v438_v12, %v93_v13 }
  0x83   :  { %v90_v26 = vpop.f32.mrf.mxu0 }
  0x84   :  { %v91_v27 = vadd.f32 %v438_v12, %v90_v26  ;;  %v296_v26 = vld [vmem:[%s674_s11] sm:$0xff] }
  0x87   :  { %v219_v16 = vpop.f32.mrf.mxu3 }
  0x88   :  { %v123_v17 = vpop.f32.mrf.mxu1  ;;  %v220_v38 = vadd.f32 %v439_v30, %v219_v16 }
  0x89   :  { %v124_v18 = vadd.f32 %v440_v15, %v123_v17 }
  0x8a   :  { %v216_v29 = vpop.f32.mrf.mxu2 }
  0x8b   :  { %141 = vrot.lane.b32.xlu0 %v124_v18, %s464_s2  ;;  %v129_v28 = vadd.f32 %v124_v18, %v91_v27  ;;  %v217_v31 = vadd.f32 %v439_v30, %v216_v29  ;;  %v344_v29 = vld [vmem:[%s675_s13 + $0x8] sm:$0xff]  ;;  %v343_v30 = vld [vmem:[%s675_s13] sm:$0xff] }
  0x8c   :  { %373 = vmatpush.msrb.mxu2 %v344_v29 }
  0x8d   :  { %v131_v32 = vmul.f32 0.5, %v129_v28 }
  0x8e   :  { %374 = vmatpush.msrb.mxu2 %v343_v30 }
  0x8f   :  { %v242_v20 = vpop.f32.mrf.mxu3  ;;  %444 = vtanh.f32 %v131_v32 }
  0x90   :  { %v243_v21 = vadd.f32 %v441_v19, %v242_v20  ;;  %v126_v22 = vpop.f32.mrf.mxu1 }
  0x91   :  { %v127_v23 = vadd.f32 %v440_v15, %v126_v22 }
  0x92   :  { %v248_v33 = vadd.f32 %v243_v21, %v217_v31 }
  0x93   :  { %143 = vrot.lane.b32.xlu1 %v127_v23, %s464_s2  ;;  %260 = vrot.lane.b32.xlu0 %v243_v21, %s464_s2  ;;  %v130_v34 = vadd.f32 %v127_v23, %v604_v14 }
  0x94   :  { %v250_v35 = vmul.f32 0.5, %v248_v33 }
  0x95   :  { %v132_v36 = vmul.f32 0.5, %v130_v34  ;;  %v445_v37 = vpop.eup %444 }
  0x96   :  { %446 = vtanh.f32 %v250_v35  ;;  %v135_v40 = vadd.f32 1.0, %v445_v37 }
  0x97   :  { %v245_v24 = vpop.f32.mrf.mxu3  ;;  %448 = vtanh.f32 %v132_v36  ;;  %v20_v36 = vstv %s676_s12 }
  0x98   :  { %v246_v25 = vadd.f32 %v441_v19, %v245_v24  ;;  %v137_v43 = vmul.f32 0.5, %v135_v40  ;;  %21 = vst [vmem:[#allocation2] sm:$0x1] %v20_v36 }
  0x9a   :  { %v249_v39 = vadd.f32 %v246_v25, %v220_v38  ;;  %v161_v9 = vsub.f32 1.0, %v137_v43 }
  0x9b   :  { %262 = vrot.lane.b32.xlu1 %v246_v25, %s464_s2  ;;  %v297_v25 = vld [vmem:[%s674_s11 + $0x8] sm:$0xff] }
  0x9c   :  { %v251_v41 = vmul.f32 0.5, %v249_v39  ;;  %v447_v42 = vpop.eup %446  ;;  %326 = vmatpush.msrb.mxu0 %v297_v25 }
  0x9d   :  { %v449_v44 = vpop.eup %448  ;;  %v254_v48 = vadd.f32 1.0, %v447_v42 }
  0x9e   :  { %450 = vtanh.f32 %v251_v41  ;;  %v136_v47 = vadd.f32 1.0, %v449_v44  ;;  %327 = vmatpush.msrb.mxu0 %v296_v26 }
  0x9f   :  { %v256_v50 = vmul.f32 0.5, %v254_v48  ;;  %v442_v40 = vld [vmem:[#allocation2] ss:$0 sm:$0xff] }
  0xa0   :  { %v138_v49 = vmul.f32 0.5, %v136_v47  ;;  %v22_v47 = vstv %s677_s14 }
  0xa1   :  { %23 = vst [vmem:[#allocation3] sm:$0x1] %v22_v47 }
  0xa2   :  { %v162_v16 = vsub.f32 1.0, %v138_v49 }
  0xa4   :  { %v451_v51 = vpop.eup %450 }
  0xa5   :  { %v255_v56 = vadd.f32 1.0, %v451_v51 }
  0xa7   :  { %v257_v57 = vmul.f32 0.5, %v255_v56 }
  0xa8   :  { %v443_v51 = vld [vmem:[#allocation3] ss:$0 sm:$0xff] }
  0xfd   :  { %v142_v45 = vpop.permute.xlu0 %141 }
  0xfe   :  { %v147_v46 = vmul.f32 %v142_v45, %v137_v43 }
 0x100   :  { %151 = vrot.lane.b32.xlu2 %v147_v46, %s465_s9 }
 0x105   :  { %v144_v52 = vpop.permute.xlu1 %143  ;;  %v261_v53 = vpop.permute.xlu0 %260 }
 0x106   :  { %v148_v54 = vmul.f32 %v144_v52, %v138_v49  ;;  %v266_v55 = vmul.f32 %v261_v53, %v256_v50 }
 0x108   :  { %153 = vrot.lane.b32.xlu0 %v148_v54, %s465_s9  ;;  %270 = vrot.lane.b32.xlu2 %v266_v55, %s465_s9 }
 0x10d   :  { %v263_v58 = vpop.permute.xlu1 %262 }
 0x10e   :  { %v267_v59 = vmul.f32 %v263_v58, %v257_v57 }
 0x110   :  { %272 = vrot.lane.b32.xlu1 %v267_v59, %s465_s9  ;;  %173 = vrot.lane.b32.xlu0 %v586_v10, %s466_s10 }
 0x118   :  { %175 = vrot.lane.b32.xlu0 %v595_v11, %s466_s10 }
 0x15a   :  { %v152_v60 = vpop.permute.xlu2 %151 }
 0x15b   :  { %v157_v61 = vadd.f32 %v152_v60, %v91_v27  ;;  %v281_v27 = vsub.f32 1.0, %v257_v57 }
 0x15d   :  { %452 = vtanh.f32 %v157_v61 }
 0x162   :  { %v271_v62 = vpop.permute.xlu2 %270 }
 0x163   :  { %v453_v63 = vpop.eup %452  ;;  %v276_v0 = vadd.f32 %v271_v62, %v217_v31 }
 0x164   :  { %165 = vrot.lane.b32.xlu2 %v453_v63, %s467_s27 }
 0x165   :  { %454 = vtanh.f32 %v276_v0 }
 0x16b   :  { %v455_v1 = vpop.eup %454 }
 0x16c   :  { %284 = vrot.lane.b32.xlu1 %v455_v1, %s467_s27 }
 0x17a   :  { %v154_v2 = vpop.permute.xlu0 %153 }
 0x17b   :  { %v158_v3 = vadd.f32 %v154_v2, %v604_v14  ;;  %v280_v14 = vsub.f32 1.0, %v256_v50 }
 0x17d   :  { %456 = vtanh.f32 %v158_v3 }
 0x182   :  { %v273_v4 = vpop.permute.xlu1 %272  ;;  %v174_v8 = vpop.permute.xlu0 %173 }
 0x183   :  { %v457_v5 = vpop.eup %456  ;;  %v277_v6 = vadd.f32 %v273_v4, %v220_v38  ;;  %v179_v11 = vmul.f32 %v174_v8, %v137_v43  ;;  %v292_v19 = vmul.f32 %v256_v50, %v174_v8 }
 0x184   :  { %167 = vrot.lane.b32.xlu2 %v457_v5, %s467_s27 }
 0x185   :  { %458 = vtanh.f32 %v277_v6 }
 0x18a   :  { %v176_v15 = vpop.permute.xlu0 %175 }
 0x18b   :  { %v459_v7 = vpop.eup %458  ;;  %v180_v20 = vmul.f32 %v176_v15, %v138_v49  ;;  %v293_v31 = vmul.f32 %v257_v57, %v176_v15 }
 0x18c   :  { %286 = vrot.lane.b32.xlu1 %v459_v7, %s467_s27 }
 0x1be   :  { %v166_v10 = vpop.permute.xlu2 %165 }
 0x1bf   :  { %v171_v12 = vmul.f32 %v166_v10, %v161_v9 }
 0x1c1   :  { %v181_v13 = vadd.f32 %v179_v11, %v171_v12 }
 0x1c3   :  { %304 = vrot.lane.b32.xlu2 %v181_v13, %s467_s27 }
 0x1de   :  { %v285_v17 = vpop.permute.xlu1 %284  ;;  %v168_v18 = vpop.permute.xlu2 %167 }
 0x1df   :  { %v290_v21 = vmul.f32 %v285_v17, %v280_v14  ;;  %v172_v22 = vmul.f32 %v168_v18, %v162_v16 }
 0x1e1   :  { %v294_v23 = vadd.f32 %v292_v19, %v290_v21  ;;  %v182_v24 = vadd.f32 %v180_v20, %v172_v22 }
 0x1e3   :  { %351 = vrot.lane.b32.xlu0 %v294_v23, %s467_s27  ;;  %306 = vrot.lane.b32.xlu1 %v182_v24, %s467_s27 }
 0x1fe   :  { %v287_v28 = vpop.permute.xlu1 %286 }
 0x1ff   :  { %v291_v32 = vmul.f32 %v287_v28, %v281_v27 }
 0x201   :  { %v295_v33 = vadd.f32 %v293_v31, %v291_v32 }
 0x203   :  { %353 = vrot.lane.b32.xlu2 %v295_v33, %s467_s27 }
 0x21d   :  { %v305_v34 = vpop.permute.xlu2 %304 }
 0x21e   :  { %v402_v35 = vsel %vm99_vm1, %v305_v34, %v294_v23  ;;  %427 = vmatmul.msk.f32.vlgmr.msrb.gmra.mxu0 %vm99_vm1, %v305_v34 }
 0x255   :  { %v352_v37 = vpop.permute.xlu0 %351  ;;  %v307_v38 = vpop.permute.xlu1 %306 }
 0x256   :  { %428 = vmatmul.msk.f32.gmra.mxu0 %vm99_vm1, %v307_v38  ;;  %429 = vmatmul.msk.f32.vlgmr.msrb.gmra.mxu2 %vm99_vm1, %v352_v37  ;;  %v403_v3 = vsel %vm99_vm1, %v307_v38, %v295_v33 }
 0x25d   :  { %v354_v39 = vpop.permute.xlu2 %353 }
 0x25e   :  { %430 = vmatmul.msk.f32.gmra.mxu2 %vm99_vm1, %v354_v39 }
 0x29b   :  { %v329_v41 = vpop.f32.mrf.mxu0 }
 0x29c   :  { %v330_v42 = vadd.f32 %v442_v40, %v329_v41 }
 0x29e   :  { %v335_v43 = vmul.f32 0.5, %v330_v42 }
 0x2a0   :  { %460 = vtanh.f32 %v335_v43 }
 0x2a6   :  { %v461_v44 = vpop.eup %460 }
 0x2a7   :  { %v339_v45 = vadd.f32 1.0, %v461_v44 }
 0x2a9   :  { %v341_v46 = vmul.f32 0.5, %v339_v45 }
 0x2ab   :  { %388 = vrot.lane.b32.xlu0 %v341_v46, %s465_s9 }
 0x2d3   :  { %v332_v48 = vpop.f32.mrf.mxu0 }
 0x2d4   :  { %v333_v49 = vadd.f32 %v442_v40, %v332_v48 }
 0x2d6   :  { %v336_v50 = vmul.f32 0.5, %v333_v49 }
 0x2d8   :  { %462 = vtanh.f32 %v336_v50 }
 0x2d9   :  { %v376_v52 = vpop.f32.mrf.mxu2 }
 0x2da   :  { %v377_v53 = vadd.f32 %v443_v51, %v376_v52 }
 0x2dc   :  { %v382_v54 = vmax.f32 %v377_v53, 0.0 }
 0x2de   :  { %v463_v55 = vpop.eup %462  ;;  %396 = vrot.lane.b32.xlu2 %v382_v54, %s468_s20 }
 0x2df   :  { %v340_v56 = vadd.f32 1.0, %v463_v55 }
 0x2e1   :  { %v342_v57 = vmul.f32 0.5, %v340_v56  ;;  %v379_v58 = vpop.f32.mrf.mxu2 }
 0x2e2   :  { %v380_v59 = vadd.f32 %v443_v51, %v379_v58 }
 0x2e3   :  { %390 = vrot.lane.b32.xlu1 %v342_v57, %s465_s9 }
 0x2e4   :  { %v383_v60 = vmax.f32 %v380_v59, 0.0 }
 0x2e6   :  { %398 = vrot.lane.b32.xlu0 %v383_v60, %s468_s20 }
 0x31d   :  { %v389_v61 = vpop.permute.xlu0 %388 }
 0x31e   :  { %v405_v62 = vsel %vm404_vm2, %v402_v35, %v389_v61 }
 0x338   :  { %v397_v63 = vpop.permute.xlu2 %396 }
 0x339   :  { %v408_v0 = vsel %vm407_vm3, %v405_v62, %v397_v63 }
 0x33a   :  { %v411_v1 = vsel %vm410_vm4, %v408_v0, 0.0 }
 0x33b   :  { %413 = vst [vmem:[%s678_s15] sm:$0xff] %v411_v1 }
 0x355   :  { %v391_v2 = vpop.permute.xlu1 %390 }
 0x356   :  { %v406_v4 = vsel %vm404_vm2, %v403_v3, %v391_v2 }
 0x358   :  { %v399_v5 = vpop.permute.xlu0 %398 }
 0x359   :  { %v409_v6 = vsel %vm407_vm3, %v406_v4, %v399_v5 }
 0x35a   :  { %v412_v7 = vsel %vm410_vm4, %v409_v6, 0.0 }
 0x35b   :  { %414 = vst [vmem:[%s678_s15 + $0x8] sm:$0xff] %v412_v7 }

// kernel: _lambda_.3
= control target key start
LH: loop header
LB: loop body
LE: loop exit
PB: predicated region body
PF: predicated region fallthrough
CT: control target
= control target key end

     0   :  { %s1985_s0 = inlined_call_operand.hbm [shape: f32[16,8], index: 0, kind: input, shape index: {}]   ;;  %s1986_s1 = inlined_call_operand.hbm [shape: f32[16,8], index: 1, kind: input, shape index: {}]   ;;  %s1987_s2 = inlined_call_operand.vmem [shape: f32[16,3], index: 2, kind: input, shape index: {}]   ;;  %s1988_s3 = inlined_call_operand.hbm [shape: s32[2,16,1], index: 3, kind: input, shape index: {}]   ;;  %s1989_s4 = inlined_call_operand.hbm [shape: s32[2,16,1], index: 4, kind: input, shape index: {}]   ;;  %s1990_s5 = inlined_call_operand.vmem [shape: s32[2,1,16], index: 5, kind: input, shape index: {}]   ;;  %s1991_s6 = inlined_call_operand.hbm [shape: f32[2,8,28], index: 6, kind: input, shape index: {}]   ;;  %s1992_s7 = inlined_call_operand.hbm [shape: f32[2,8,22], index: 7, kind: input, shape index: {}]   ;;  %s1993_s8 = inlined_call_operand.vmem [shape: f32[2,16,128], index: 8, kind: output, shape index: {0}]   ;;  %s1994_s9 = inlined_call_operand.vmem [shape: f32[2,16,128], index: 9, kind: output, shape index: {1}]  }
   0x1   :  { %2003 = sst [smem:[#allocation16_spill]] %s1985_s0 }
   0x2   :  { %2004 = sst [smem:[#allocation17_spill]] %s1988_s3 }
   0x3   :  { %2005 = sst [smem:[#allocation18_spill]] %s1989_s4 }
   0x4   :  { %15 = vsyncpa [#allocation3], 0 }
   0x5   :  { %16 = vsyncpa [#allocation5], 0  ;;  %s1679_s30 = smov 0   ;;  %s1681_s10 = smov 0  }
   0x6   :  { %s1683_s11 = smov 0   ;;  %s1685_s12 = smov 0  }
   0x7 LB: > { %2006 = sst [smem:[#allocation13_spill]] %s1614_s11  ;;  %s1698_s13 = sadd.s32 4294967295, %s1618_s12   ;;  %s1618_s12 = sphi %s1685_s12, %s2019_s12   ;;  %s1614_s11 = sphi %s1683_s11, %s2021_s11   ;;  %s1610_s10 = sphi %s1681_s10, %s2023_s10   ;;  %s1606_s30 = sphi %s1679_s30, %s2022_s30  }
   0x8   : > { %p105_p0 = scmp.ne.s32.totalorder %s1610_s10, %s1606_s30  ;;  %p106_p1 = scmp.eq.s32.totalorder %s1698_s13, 0 }
   0x9   : > { %p1226_p2 = scmp.ge.s32.totalorder %s1618_s12, 1  ;;  %p272_p3 = scmp.lt.s32.totalorder %s1618_s12, 3 }
   0xa   : > { %p1706_p4 = por %p106_p1, %p105_p0  ;;  %s2008_s0 = sld [smem:[#allocation16_spill]] }
   0xb   : > { %p1713_p5 = pnand %p1226_p2, %p272_p3  ;;  %s1620_s19 = smov [#allocation2]  }
   0xc   : > { %s285_s20 = sshll.u32 %s1620_s19, 4  ;;  %s1726_s22 = sadd.s32 1, %s1618_s12   ;;  %s286_s20 = int_to_ptr.vmem [resolvable:$true] %s285_s20 }
   0xd   : > { %p1308_p6 = pneg %p1713_p5  ;;  %2011 = sst [smem:[#allocation14_spill]] %s1726_s22 }
   0xe   : > { %s1995_s23 = smov 128   ;;  %s1997_s24 = smov 8  }
   0xf   : > { %p1721_p7 = pnand %p1308_p6, %p106_p1  ;;  %s89_s25 = ssub.s32 %s1618_s12, %s1726_s22 }
  0x10   : > { %s283_s17 = sshll.u32 %s2008_s0, 4  ;;  %s92_s26 = sadd.s32 1, %s1614_s11  ;;  %s284_s17 = int_to_ptr.hbm [resolvable:$true] %s283_s17 }
  0x11   : > { %1311 = dma.hbm_to_vmem [thread:$0]  (!%p1721_p7), %s284_s17, 256, %s286_s20, [#allocation3], %s1995_s23, %s1995_s23, %s1997_s24  }
  0x12   : > { %p90_p8 = scmp.eq.s32.totalorder %s89_s25, 0  ;;  %p99_p9 = scmp.ne.s32.totalorder %s1614_s11, %s1610_s10 }
  0x13   : > { %p100_p10 = scmp.eq.s32.totalorder %s1618_s12, 0  ;;  %p1330_p11 = scmp.lt.s32.totalorder %s1618_s12, 2 }
  0x14   : > { %s1741_s27 = scalar_select %p90_p8, %s1614_s11, %s92_s26  }
  0x15   : > { %p101_p12 = por %p100_p10, %p99_p9  ;;  %s316_s28 = sand.u32 1, %s1618_s12  }
  0x16   : > { %2012 = sst [smem:[#allocation15_spill]] %s1741_s27  ;;  %s1999_s29 = sand.u32 1, %s1614_s11  }
  0x17   : > { %s1230_s30 = sshll.u32 %s1999_s29, 4  ;;  %s1288_s15 = sshll.u32 %s1618_s12, 4 }
  0x18   : > { %s2013_s3 = sld [smem:[#allocation17_spill]]  ;;  %s320_s20 = scalar_lea.vmem [#allocation6], %s1230_s30 }
  0x19   : > { %s328_s23 = sshll.u32 %s320_s20, 4  ;;  %p1753_p13 = pnand %p1330_p11, %p101_p12  ;;  %s329_s23 = int_to_ptr.vmem [resolvable:$true] %s328_s23 }
  0x1a   : > { %s2015_s4 = sld [smem:[#allocation18_spill]]  ;;  %s342_s27 = scalar_lea.vmem [#allocation7], %s1230_s30 }
  0x1b   : > { %s1760_s22 = sshll.u32 %s342_s27, 4  ;;  %p1430_p2 = pneg %p1753_p13  ;;  %s351_s22 = int_to_ptr.vmem [resolvable:$true] %s1760_s22 }
  0x1e   : > { %s325_s0 = scalar_lea.hbm %s2013_s3, %s1288_s15 }
  0x1f   : > { %s326_s17 = sshll.u32 %s325_s0, 4  ;;  %s1762_s0 = scalar_lea.sflag [#allocation3], %s316_s28  ;;  %s327_s17 = int_to_ptr.hbm [resolvable:$true] %s326_s17 }
  0x20   : > { %s347_s29 = scalar_lea.hbm %s2015_s4, %s1288_s15  ;;  %s1426_s19 = sshra.s32 %s327_s17, 4  ;;  %s1427_s19 = int_to_ptr.hbm [resolvable:$true] %s1426_s19 }
  0x21   : > { %s348_s16 = sshll.u32 %s347_s29, 4  ;;  %s1428_s20 = scalar_lea.hbm %s1427_s19, 16  ;;  %s349_s16 = int_to_ptr.hbm [resolvable:$true] %s348_s16 }
  0x22   : > { %p1429_p0 = scmp.ne.s32.totalorder %s1427_s19, %s1428_s20  ;;  %s1433_s15 = scalar_lea.hbm %s2013_s3, 32 }
  0x23   : > { %p1434_p8 = scmp.lt.s32.totalorder %s1427_s19, %s2013_s3  ;;  %p1435_p9 = scmp.lt.s32.totalorder %s1433_s15, %s1428_s20 }
  0x24   : > { %p1431_p3 = pnand %p1430_p2, %p1429_p0 }
  0x25   : > { %p1436_p10 = por %p1435_p9, %p1434_p8 }
  0x26   : > { %p1432_p6 = pneg %p1431_p3 }
  0x28   : > { %p1437_p11 = pnand %p1436_p10, %p1432_p6 }
  0x2a   : > { %1440 = shalt.err (!%p1437_p11)
}
  0x2b   : > { %s2016_s28 = smov 8   ;;  %s2017_s29 = smov 128  }
  0x2c   : > { %1318 = dma.hbm_to_vmem [thread:$0]  (!%p1753_p13), %s327_s17, 256, %s329_s23, %s1762_s0, %s2017_s29, %s2017_s29, %s2016_s28  }
  0x2d   : > { %s1456_s24 = sshra.s32 %s349_s16, 4  ;;  %s1463_s15 = scalar_lea.hbm %s2015_s4, 32  ;;  %s1457_s24 = int_to_ptr.hbm [resolvable:$true] %s1456_s24 }
  0x2e   : > { %s1458_s26 = scalar_lea.hbm %s1457_s24, 16  ;;  %p1464_p6 = scmp.lt.s32.totalorder %s1457_s24, %s2015_s4 }
  0x2f   : > { %p1459_p12 = scmp.ne.s32.totalorder %s1457_s24, %s1458_s26  ;;  %p1465_p8 = scmp.lt.s32.totalorder %s1463_s15, %s1458_s26 }
  0x31   : > { %p1461_p0 = pnand %p1459_p12, %p1430_p2  ;;  %p1466_p9 = por %p1465_p8, %p1464_p6 }
  0x33   : > { %p1462_p3 = pneg %p1461_p0 }
  0x35   : > { %p1467_p10 = pnand %p1466_p9, %p1462_p3 }
  0x37   : > { %1470 = shalt.err (!%p1467_p10)
}
  0x38   : > { %1321 = dma.hbm_to_vmem [thread:$0]  (!%p1753_p13), %s349_s16, 256, %s351_s22, %s1762_s0, %s2017_s29, %s2017_s29, %s2016_s28  }
  0x39   : > { %s2018_s23 = sand.u32 1, %s1614_s11   ;;  %s1237_s24 = sshll.u32 %s1618_s12, 3 }
  0x3a   : > { %s1799_s17 = sshll.u32 %s2018_s23, 3  ;;  %s374_s20 = scalar_lea.hbm %s1991_s6, %s1237_s24 }
  0x3b   : > { %s376_s15 = sshll.u32 %s374_s20, 4  ;;  %s370_s30 = scalar_lea.vmem [#allocation8], %s1799_s17  ;;  %s377_s15 = int_to_ptr.hbm [resolvable:$true] %s376_s15 }
  0x3c   : > { %s378_s27 = sshll.u32 %s370_s30, 4  ;;  %s1486_s3 = sshra.s32 %s377_s15, 4  ;;  %s379_s27 = int_to_ptr.vmem [resolvable:$true] %s378_s27  ;;  %s1487_s3 = int_to_ptr.hbm [resolvable:$true] %s1486_s3 }
  0x3d   : > { %s1488_s4 = scalar_lea.hbm %s1487_s3, 8  ;;  %s1493_s23 = scalar_lea.hbm %s1991_s6, 16 }
  0x3e   : > { %p1489_p11 = scmp.ne.s32.totalorder %s1487_s3, %s1488_s4  ;;  %p1494_p3 = scmp.lt.s32.totalorder %s1487_s3, %s1991_s6 }
  0x3f   : > { %p1495_p6 = scmp.lt.s32.totalorder %s1493_s23, %s1488_s4 }
  0x40   : > { %p1491_p12 = pnand %p1489_p11, %p1430_p2 }
  0x41   : > { %p1496_p8 = por %p1495_p6, %p1494_p3 }
  0x42   : > { %p1492_p0 = pneg %p1491_p12 }
  0x44   : > { %p1497_p9 = pnand %p1496_p8, %p1492_p0 }
  0x46   : > { %1500 = shalt.err (!%p1497_p9)
}
  0x47   : > { %1324 = dma.hbm_to_vmem [thread:$0]  (!%p1753_p13), %s377_s15, 128, %s379_s27, %s1762_s0  }
  0x48   : > { %s297_s30 = sshll.u32 %s1986_s1, 4  ;;  %s1623_s22 = smov [#allocation4]   ;;  %s298_s30 = int_to_ptr.hbm [resolvable:$true] %s297_s30 }
  0x49   : > { %s299_s11 = sshll.u32 %s1623_s22, 4  ;;  %s393_s16 = scalar_lea.hbm %s1992_s7, %s1237_s24  ;;  %s300_s11 = int_to_ptr.vmem [resolvable:$true] %s299_s11 }
  0x4a   : > { %1314 = dma.hbm_to_vmem [thread:$0]  (!%p1721_p7), %s298_s30, 256, %s300_s11, [#allocation5], %s2017_s29, %s2017_s29, %s2016_s28  }
  0x4b   : > { %s389_s15 = scalar_lea.vmem [#allocation9], %s1799_s17  ;;  %s395_s23 = sshll.u32 %s393_s16, 4  ;;  %s396_s23 = int_to_ptr.hbm [resolvable:$true] %s395_s23 }
  0x4c   : > { %s397_s27 = sshll.u32 %s389_s15, 4  ;;  %s1546_s26 = sshra.s32 %s396_s23, 4  ;;  %s398_s27 = int_to_ptr.vmem [resolvable:$true] %s397_s27  ;;  %s1547_s26 = int_to_ptr.hbm [resolvable:$true] %s1546_s26 }
  0x4d   : > { %s1548_s19 = scalar_lea.hbm %s1547_s26, 8  ;;  %s1553_s12 = scalar_lea.hbm %s1992_s7, 16 }
  0x4e   : > { %p1549_p10 = scmp.ne.s32.totalorder %s1547_s26, %s1548_s19  ;;  %p1554_p7 = scmp.lt.s32.totalorder %s1547_s26, %s1992_s7 }
  0x4f   : > { %p1555_p0 = scmp.lt.s32.totalorder %s1553_s12, %s1548_s19 }
  0x50   : > { %p1551_p11 = pnand %p1549_p10, %p1430_p2 }
  0x51   : > { %p1556_p3 = por %p1555_p0, %p1554_p7 }
  0x52   : > { %p1552_p12 = pneg %p1551_p11 }
  0x54   : > { %p1557_p6 = pnand %p1556_p3, %p1552_p12 }
  0x56   : > { %1560 = shalt.err (!%p1557_p6)
}
  0x57   : > { %1327 = dma.hbm_to_vmem [thread:$0]  (!%p1753_p13), %s396_s23, 128, %s398_s27, %s1762_s0  }
  0x58   : > { %406 = sbr.rel (%p1713_p5) target bundleno = 1106 (0x452), region = 52 }
  0x5d   : > { %1593 = dma.done.wait (%p106_p1), [#allocation3], 256  }
  0x5e   : > { %1595 = vsyncadd (%p106_p1), [#allocation3], 4294967040 }
  0x5f   : > { %1597 = dma.done.wait (%p106_p1), [#allocation5], 256  }
  0x60   : > { %1599 = vsyncadd (%p106_p1), [#allocation5], 4294967040  ;;  %s418_s25 = sand.u32 1, %s1698_s13   ;;  %s420_s0 = sand.u32 1, %s1610_s10  }
  0x61   : > { %s1858_s17 = sshll.u32 %s420_s0, 4  ;;  %s419_s18 = scalar_lea.sflag [#allocation3], %s418_s25 }
  0x62   : > { %s422_s24 = scalar_lea.vmem [#allocation6], %s1858_s17 }
  0x63   : > { %1601 = dma.done.wait (%p1706_p4), %s419_s18, 768  }
  0x64   : > { %1603 = vsyncadd (%p1706_p4), %s419_s18, 4294966528  ;;  %s1245_s30 = sshll.u32 %s420_s0, 3  ;;  %vm527_vm0 = vcmask 64512   ;;  %v524_v1 = vld [vmem:[#allocation2] sm:$0xff]  ;;  %v525_v2 = vld [vmem:[#allocation2 + $0x8] sm:$0xff]  ;;  %v1624_v4 = vmov 0   ;;  %v589_v15 = vlaneseq }
  0x65   : > { %s442_s22 = scalar_lea.vmem [#allocation8], %s1245_s30  ;;  %v591_v3 = vld [vmem:[%s422_s24] sm:$0xff]  ;;  %1384 = vset.pattern.permute.xlu1 %v1624_v4  ;;  %1385 = vset.pattern.permute.xlu2 %v1624_v4  ;;  %s432_s14 = scalar_lea.vmem [#allocation7], %s1858_s17  ;;  %v592_v8 = vld [vmem:[%s422_s24 + $0x8] sm:$0xff]  ;;  %v1628_v23 = vmov 0.0   ;;  %vm652_vm2 = vcmask 130048  }
  0x66   : > { %v526_v0 = vld [vmem:[%s442_s22] sm:$0xff]  ;;  %594 = vperm.xlu1 %1384, %v591_v3   ;;  %1386 = vset.pattern.permute.xlu0 %v1624_v4  ;;  %s452_s11 = scalar_lea.vmem [#allocation9], %s1245_s30  ;;  %v557_v7 = vld [vmem:[#allocation4] sm:$0xff]  ;;  %v606_v9 = vld [vmem:[%s432_s14 + $0x8] sm:$0xff]  ;;  %s1625_s3 = smov 106   ;;  %v1870_v17 = vand.u32 127, %v589_v15 }
  0x67   : > { %549 = vmatpush.msra.mxu0 %v526_v0  ;;  %v605_v5 = vld [vmem:[%s432_s14] sm:$0xff]  ;;  %v559_v6 = vld [vmem:[%s452_s11] sm:$0xff]  ;;  %597 = vperm.xlu2 %1385, %v592_v8   ;;  %s1626_s4 = smov 112   ;;  %s1627_s27 = smov 3   ;;  %v728_v26 = vld [vmem:[%s1987_s2 + $0x8] sm:$0xff]  ;;  %v1913_v36 = vshrl.u32 %v589_v15, 7 }
  0x68   : > { %1251 = vmatmul.msk.f32.vlgmr.msra.gmra.mxu0 %vm527_vm0, %v524_v1  ;;  %581 = vmatpush.msra.mxu1 %v559_v6  ;;  %v558_v10 = vld [vmem:[#allocation4 + $0x8] sm:$0xff]  ;;  %v727_v20 = vld [vmem:[%s1987_s2] sm:$0xff]  ;;  %v630_v35 = vmul.u32 3, %v1870_v17  ;;  %vm749_vm9 = vcmask 1045504   ;;  %vm737_vm10 = vcmask 23552   ;;  %vm742_vm11 = vcmask 48128  }
  0x69   : > { %1253 = vmatmul.msk.f32.vlgmr.msra.gmra.mxu1 %vm527_vm0, %v557_v7  ;;  %p511_p1 = scmp.lt.s32.totalorder %s1698_s13, 1  ;;  %v637_v55 = vmul.u32 8, %v1913_v36  ;;  %vm890_vm14 = vcmask 1041408  }
  0x6a   : > { %v632_v37 = vadd.s32 3, %v630_v35  ;;  %vm631_vm6 = vcmp.ge.s32.totalorder %v1913_v36, %v630_v35 }
  0x6b   : > { %s2025_s13 = smov (!%p511_p1, %s1698_s13), 1  ;;  %vm638_vm12 = vcmp.ge.s32.totalorder %v1870_v17, %v637_v55  ;;  %v639_v57 = vadd.s32 8, %v637_v55 }
  0x6c   : > { %vm633_vm7 = vcmp.lt.s32.totalorder %v1913_v36, %v632_v37  ;;  %s513_s28 = scalar_lea.vmem %s1990_s5, %s2025_s13  ;;  %s1290_s20 = sshll.u32 %s2025_s13, 4 }
  0x6d   : > { %vm634_vm8 = vmand %vm631_vm6, %vm633_vm7  ;;  %vm640_vm13 = vcmp.lt.s32.totalorder %v1870_v17, %v639_v57  ;;  %s518_s17 = scalar_lea.vmem %s1993_s8, %s1290_s20  ;;  %s523_s24 = scalar_lea.vmem %s1994_s9, %s1290_s20 }
  0x6e   : > { %608 = vperm.xlu1 %1384, %v605_v5   ;;  %v1261_v38 = vsel %vm634_vm8, 1.0, %v1628_v23  ;;  %vm641_vm15 = vmand %vm638_vm12, %vm640_vm13 }
  0x6f   : > { %611 = vperm.xlu2 %1385, %v606_v9   ;;  %1267 = vmatpush.msk.msrb.mxu0 %vm749_vm9, %v1261_v38  ;;  %v1262_v59 = vsel %vm641_vm15, 1.0, %v1628_v23 }
  0x70   : > { %1252 = vmatmul.msk.f32.gmra.mxu0 %vm527_vm0, %v525_v2 }
  0x71   : > { %1254 = vmatmul.msk.f32.gmra.mxu1 %vm527_vm0, %v558_v10 }
  0x76   : > { %731 = vrot.lane.b32.xlu1 %v727_v20, %s1627_s27 }
  0xc1   : > { %v598_v16 = vpop.permute.xlu2 %597 }
  0xc2   : > { %vm600_vm5 = vcmp.eq.s32.totalorder %v1870_v17, %v598_v16 }
  0xc3   : > { %v1904_v34 = vsel %vm600_vm5, 1.0, %v1628_v23 }
  0xc9   : > { %v612_v27 = vpop.permute.xlu2 %611 }
  0xca   : > { %vm614_vm3 = vcmp.eq.s32.totalorder %v1870_v17, %v612_v27 }
  0xcb   : > { %v1893_v31 = vsel %vm614_vm3, 1.0, %v1628_v23 }
  0xd8   : > { %v595_v14 = vpop.permute.xlu1 %594 }
  0xd9   : > { %vm599_vm4 = vcmp.eq.s32.totalorder %v1870_v17, %v595_v14 }
  0xda   : > { %v1896_v33 = vsel %vm599_vm4, 1.0, %v1628_v23 }
  0xe0   : > { %v609_v18 = vpop.permute.xlu1 %608 }
  0xe1   : > { %vm613_vm1 = vcmp.eq.s32.totalorder %v1870_v17, %v609_v18  ;;  %v621_v17 = vadd.s32 8, %v1913_v36 }
  0xe2   : > { %v1880_v24 = vsel %vm613_vm1, 1.0, %v1628_v23  ;;  %vm782_vm1 = vcmask 15360  }
  0xe5   : > { %v551_v11 = vpop.f32.mrf.mxu0 }
  0xe6   : > { %v1872_v19 = vpop.f32.mrf.mxu1 }
  0xe8   : > { %v732_v41 = vpop.permute.xlu1 %731 }
  0xe9   : > { %v738_v44 = vsel %vm737_vm10, %v727_v20, %v732_v41 }
  0xed   : > { %v554_v12 = vpop.f32.mrf.mxu0 }
  0xee   : > { %v1374_v13 = vpack.i.bf16 %v551_v11, %v554_v12  ;;  %v1887_v28 = vpop.f32.mrf.mxu1 }
  0xef   : > { %721 = vrot.lane.b32.xlu2 %v1887_v28, %s1626_s4 }
  0xf0   : > { %1375 = vrot.lane.b32.xlu0 %v1374_v13, %s1625_s3 }
  0xf8   : > { %1380 = vrot.lane.b32.xlu0 %v1374_v13, %s1626_s4  ;;  %v1387_v13 = vld [vmem:[%s513_s28] ss:$0 sm:$0xff] }
  0xf9   : > { %vm624_vm4 = vcmp.eq.s32.totalorder %v1913_v36, %v1387_v13  ;;  %vm625_vm5 = vcmp.eq.s32.totalorder %v621_v17, %v1387_v13 }
  0xfa   : > { %v1259_v16 = vsel %vm624_vm4, 1.0, %v1628_v23  ;;  %v1260_v18 = vsel %vm625_vm5, 1.0, %v1628_v23 }
 0x100   : > { %719 = vrot.lane.b32.xlu0 %v1872_v19, %s1626_s4 }
 0x108   : > { %733 = vrot.lane.b32.xlu0 %v728_v26, %s1627_s27 }
 0x149   : > { %v722_v47 = vpop.permute.xlu2 %721 }
 0x162   : > { %v1376_v21 = vpop.permute.xlu0 %1375 }
 0x163   : > { %v1377_v22 = vunpack.i.l.bf16 %v1376_v21  ;;  %v1378_v25 = vunpack.i.h.bf16 %v1376_v21 }
 0x165   : > { %673 = vmatpush.msra.mxu2 %v1377_v22 }
 0x167   : > { %674 = vmatpush.msra.mxu2 %v1378_v25 }
 0x168   : > { %1263 = vmatmul.msk.f32.vlgmr.msra.gmra.mxu2 %vm652_vm2, %v1880_v24 }
 0x169   : > { %875 = vmatpush.msrb.mxu2 %v554_v12 }
 0x16a   : > { %v1381_v29 = vpop.permute.xlu0 %1380 }
 0x16b   : > { %876 = vmatpush.msrb.mxu2 %v551_v11  ;;  %v1382_v30 = vunpack.i.l.bf16 %v1381_v29  ;;  %v1383_v32 = vunpack.i.h.bf16 %v1381_v29 }
 0x16d   : > { %708 = vmatpush.msra.mxu3 %v1382_v30 }
 0x16f   : > { %709 = vmatpush.msra.mxu3 %v1383_v32 }
 0x170   : > { %1264 = vmatmul.msk.f32.gmra.mxu2 %vm652_vm2, %v1893_v31  ;;  %1265 = vmatmul.msk.f32.vlgmr.msra.gmra.mxu3 %vm652_vm2, %v1896_v33 }
 0x171   : > { %1274 = vmatpush.msk.msrb.mxu3 %vm890_vm14, %v1262_v59 }
 0x172   : > { %v720_v39 = vpop.permute.xlu0 %719 }
 0x178   : > { %1266 = vmatmul.msk.f32.gmra.mxu3 %vm652_vm2, %v1904_v34  ;;  %1272 = vmatmul.msk.f32.vlgmr.msrb.gmra.mxu2 %vm652_vm2, %v1896_v33 }
 0x17a   : > { %v734_v48 = vpop.permute.xlu0 %733 }
 0x17b   : > { %v739_v52 = vsel %vm737_vm10, %v728_v26, %v734_v48 }
 0x180   : > { %1273 = vmatmul.msk.f32.gmra.mxu2 %vm652_vm2, %v1904_v34 }
 0x1eb   : > { %v676_v40 = vpop.f32.mrf.mxu2 }
 0x1f3   : > { %v711_v42 = vpop.f32.mrf.mxu3  ;;  %v679_v49 = vpop.f32.mrf.mxu2 }
 0x1f4   : > { %v712_v43 = vadd.f32 %v711_v42, %v676_v40 }
 0x1f6   : > { %v725_v45 = vadd.f32 %v720_v39, %v712_v43 }
 0x1f8   : > { %v740_v46 = vmul.f32 %v738_v44, %v725_v45 }
 0x1fa   : > { %1268 = vmatmul.msk.f32.vlgmr.msrb.gmra.mxu0 %vm742_vm11, %v740_v46 }
 0x1fb   : > { %v714_v50 = vpop.f32.mrf.mxu3  ;;  %v878_v20 = vpop.f32.mrf.mxu2 }
 0x1fc   : > { %v715_v51 = vadd.f32 %v714_v50, %v679_v49 }
 0x1fe   : > { %v726_v53 = vadd.f32 %v722_v47, %v715_v51 }
 0x200   : > { %v741_v54 = vmul.f32 %v739_v52, %v726_v53 }
 0x202   : > { %1269 = vmatmul.msk.f32.gmra.mxu0 %vm742_vm11, %v741_v54 }
 0x203   : > { %v881_v29 = vpop.f32.mrf.mxu2 }
 0x277   : > { %v770_v56 = vpop.f32.mrf.mxu0 }
 0x278   : > { %v778_v58 = vmul.f32 0.2, %v770_v56  ;;  %vm776_vm0 = vcmp.ge.f32.partialorder %v770_v56, 0.0 }
 0x27a   : > { %v780_v61 = vsel %vm776_vm0, %v770_v56, %v778_v58 }
 0x27b   : > { %v783_v0 = vsel %vm782_vm1, %v780_v61, -inf }
 0x27f   : > { %v773_v60 = vpop.f32.mrf.mxu0 }
 0x280   : > { %vm777_vm3 = vcmp.ge.f32.partialorder %v773_v60, 0.0  ;;  %v779_v62 = vmul.f32 0.2, %v773_v60 }
 0x282   : > { %v781_v63 = vsel %vm777_vm3, %v773_v60, %v779_v62 }
 0x283   : > { %v784_v1 = vsel %vm782_vm1, %v781_v63, -inf }
 0x284   : > { %v785_v2 = vmax.f32 %v783_v0, %v784_v1 }
 0x286   : > { %v786_v3 = vrot.slane %v785_v2, 4 }
 0x288   : > { %v787_v4 = vmax.f32 %v785_v2, %v786_v3 }
 0x28a   : > { %v788_v5 = vrot.slane %v787_v4, 2 }
 0x28c   : > { %v789_v6 = vmax.f32 %v787_v4, %v788_v5 }
 0x28e   : > { %v790_v7 = vrot.slane %v789_v6, 1 }
 0x290   : > { %v791_v8 = vmax.f32 %v789_v6, %v790_v7 }
 0x292   : > { %v792_v9 = vsub.f32 %v780_v61, %v791_v8  ;;  %v793_v10 = vsub.f32 %v781_v63, %v791_v8 }
 0x294   : > { %v794_v11 = vmul.f32 1.442695, %v792_v9  ;;  %v796_v12 = vmul.f32 1.442695, %v793_v10 }
 0x296   : > { %1388 = vpow2.f32 %v794_v11 }
 0x297   : > { %1390 = vpow2.f32 %v796_v12 }
 0x29c   : > { %v1389_v14 = vpop.eup %1388 }
 0x29d   : > { %v1391_v15 = vpop.eup %1390  ;;  %1275 = vmatmul.msk.f32.vlgmr.msrb.gmra.mxu3 %vm782_vm1, %v1389_v14 }
 0x29e   : > { %818 = vmatpush.msrb.mxu1 %v1391_v15 }
 0x2a0   : > { %819 = vmatpush.msrb.mxu1 %v1389_v14 }
 0x2a1   : > { %1270 = vmatmul.msk.f32.vlgmr.msrb.gmra.mxu1 %vm652_vm2, %v1259_v16 }
 0x2a2   : > { %1279 = vmatpush.msk.msra.mxu1 %vm890_vm14, %v1262_v59 }
 0x2a5   : > { %1276 = vmatmul.msk.f32.gmra.mxu3 %vm782_vm1, %v1391_v15 }
 0x2a9   : > { %1271 = vmatmul.msk.f32.gmra.mxu1 %vm652_vm2, %v1260_v18 }
 0x31e   : > { %v821_v21 = vpop.f32.mrf.mxu1 }
 0x31f   : > { %1392 = vrcp.f32 %v821_v21  ;;  %v840_v36 = vand.u32 2147483648, %v821_v21  ;;  %v838_v38 = vand.u32 2147483647, %v821_v21  ;;  %vm834_vm7 = vweird.f32 %v821_v21 }
 0x320   : > { %v911_v22 = vpop.f32.mrf.mxu3  ;;  %vm827_vm10 = vcmp.gt.f32.partialorder %v821_v21, 0.0 }
 0x321   : > { %v917_v39 = vmul.f32 %v911_v22, %v878_v20  ;;  %v841_v41 = vor.u32 1.1754944e-38, %v840_v36  ;;  %vm839_vm9 = vcmp.eq.f32.partialorder %v838_v38, 8.507059e+37 }
 0x325   : > { %v1393_v25 = vpop.eup %1392 }
 0x326   : > { %v830_v26 = vmul.f32 %v1393_v25, %v821_v21  ;;  %v824_v27 = vpop.f32.mrf.mxu1  ;;  %vm835_vm6 = vweird.f32 %v1393_v25 }
 0x327   : > { %1394 = vrcp.f32 %v824_v27  ;;  %vm836_vm8 = vmor %vm834_vm7, %vm835_vm6  ;;  %v855_v47 = vand.u32 2147483648, %v824_v27  ;;  %v853_v49 = vand.u32 2147483647, %v824_v27  ;;  %vm849_vm12 = vweird.f32 %v824_v27 }
 0x328   : > { %v831_v30 = vsub.f32 1.0, %v830_v26  ;;  %v914_v32 = vpop.f32.mrf.mxu3  ;;  %vm828_vm15 = vcmp.gt.f32.partialorder %v824_v27, 0.0 }
 0x329   : > { %v918_v35 = vmul.f32 %v914_v32, %v881_v29  ;;  %v856_v51 = vor.u32 1.1754944e-38, %v855_v47  ;;  %vm854_vm14 = vcmp.eq.f32.partialorder %v853_v49, 8.507059e+37 }
 0x32a   : > { %v832_v37 = vmul.f32 %v1393_v25, %v831_v30 }
 0x32b   : > { %933 = vmatpush.msra.mxu0 %v918_v35 }
 0x32c   : > { %v833_v23 = vadd.f32 %v1393_v25, %v832_v37 }
 0x32d   : > { %v1395_v40 = vpop.eup %1394  ;;  %934 = vmatpush.msra.mxu0 %v917_v39 }
 0x32e   : > { %v845_v42 = vmul.f32 %v1395_v40, %v824_v27  ;;  %1277 = vmatmul.msk.f32.vlgmr.msra.gmra.mxu0 %vm652_vm2, %v1259_v16  ;;  %v837_v43 = vsel %vm836_vm8, %v1393_v25, %v833_v23  ;;  %vm850_vm11 = vweird.f32 %v1395_v40 }
 0x32f   : > { %v842_v44 = vsel %vm839_vm9, %v841_v41, %v837_v43  ;;  %vm851_vm13 = vmor %vm849_vm12, %vm850_vm11 }
 0x330   : > { %v846_v45 = vsub.f32 1.0, %v845_v42  ;;  %v859_v46 = vsel %vm827_vm10, %v842_v44, 0.0 }
 0x331   : > { %1280 = vmatmul.msk.f32.vlgmr.msra.gmra.mxu1 %vm782_vm1, %v859_v46 }
 0x332   : > { %v847_v48 = vmul.f32 %v1395_v40, %v846_v45 }
 0x334   : > { %v848_v50 = vadd.f32 %v1395_v40, %v847_v48 }
 0x336   : > { %1278 = vmatmul.msk.f32.gmra.mxu0 %vm652_vm2, %v1260_v18  ;;  %v852_v52 = vsel %vm851_vm13, %v1395_v40, %v848_v50 }
 0x337   : > { %v857_v53 = vsel %vm854_vm14, %v856_v51, %v852_v52 }
 0x338   : > { %v860_v54 = vsel %vm828_vm15, %v857_v53, 0.0 }
 0x339   : > { %1281 = vmatmul.msk.f32.gmra.mxu1 %vm782_vm1, %v860_v54 }
 0x3ab   : > { %v936_v55 = vpop.f32.mrf.mxu0 }
 0x3ae   : > { %v965_v56 = vpop.f32.mrf.mxu1 }
 0x3af   : > { %v971_v57 = vmul.f32 %v965_v56, %v936_v55 }
 0x3b1   : > { %v1025_v58 = vmax.f32 %v971_v57, 0.0 }
 0x3b3   : > { %v1027_v59 = vsel %vm652_vm2, %v1025_v58, 0.0  ;;  %v939_v60 = vpop.f32.mrf.mxu0 }
 0x3b4   : > { %1029 = vst [vmem:[%s518_s17] sm:$0xff] %v1027_v59 }
 0x3b6   : > { %v968_v61 = vpop.f32.mrf.mxu1 }
 0x3b7   : > { %v972_v62 = vmul.f32 %v968_v61, %v939_v60 }
 0x3b9   : > { %v1026_v63 = vmax.f32 %v972_v62, 0.0  ;;  %987 = vmatpush.msra.mxu2 %v972_v62  ;;  %1012 = vmatpush.msra.mxu3 %v972_v62 }
 0x3bb   : > { %v1028_v0 = vsel %vm652_vm2, %v1026_v63, 0.0  ;;  %988 = vmatpush.msra.mxu2 %v971_v57  ;;  %1013 = vmatpush.msra.mxu3 %v971_v57 }
 0x3bc   : > { %1282 = vmatmul.msk.f32.vlgmr.msra.gmra.mxu2 %vm652_vm2, %v1896_v33  ;;  %1284 = vmatmul.msk.f32.vlgmr.msra.gmra.mxu3 %vm652_vm2, %v1880_v24  ;;  %1030 = vst [vmem:[%s518_s17 + $0x8] sm:$0xff] %v1028_v0 }
 0x3c4   : > { %1283 = vmatmul.msk.f32.gmra.mxu2 %vm652_vm2, %v1904_v34  ;;  %1285 = vmatmul.msk.f32.gmra.mxu3 %vm652_vm2, %v1893_v31 }
 0x43f   : > { %v990_v1 = vpop.f32.mrf.mxu2  ;;  %v1015_v2 = vpop.f32.mrf.mxu3 }
 0x440   : > { %v996_v3 = vadd.f32 %v990_v1, %v1872_v19 }
 0x442   : > { %v1021_v4 = vadd.f32 %v1015_v2, %v996_v3 }
 0x444   : > { %v1023_v5 = vmul.f32 0.33333334, %v1021_v4 }
 0x446   : > { %v1031_v33 = vmax.f32 %v1023_v5, 0.0 }
 0x447   : > { %v993_v6 = vpop.f32.mrf.mxu2  ;;  %v1018_v34 = vpop.f32.mrf.mxu3 }
 0x448   : > { %v1033_v24 = vsel %vm652_vm2, %v1031_v33, 0.0  ;;  %v997_v7 = vadd.f32 %v993_v6, %v1887_v28 }
 0x449   : > { %1035 = vst [vmem:[%s523_s24] sm:$0xff] %v1033_v24 }
 0x44a   : > { %v1022_v8 = vadd.f32 %v1018_v34, %v997_v7 }
 0x44c   : > { %v1024_v31 = vmul.f32 0.33333334, %v1022_v8 }
 0x44e   : > { %v1032_v9 = vmax.f32 %v1024_v31, 0.0 }
 0x450   : > { %v1034_v10 = vsel %vm652_vm2, %v1032_v9, 0.0 }
 0x451   : > { %1036 = vst [vmem:[%s523_s24 + $0x8] sm:$0xff] %v1034_v10 }
 0x452 PF: > { %s2019_s12 = sld [smem:[#allocation14_spill]]  ;;  %s2022_s30 = smov %s1610_s10 }
 0x453   : > { %s2020_s22 = sld [smem:[#allocation13_spill]] }
 0x454   : > { %s2021_s11 = sld [smem:[#allocation15_spill]] }
 0x458   : > { %p19_p4 = scmp.ge.s32.totalorder %s2019_s12, 4  }
 0x459   : > { %s2023_s10 = smov %s2020_s22 }
 0x45a   :  { %21 = sbr.rel (!%p19_p4) target bundleno = 7 (0x7), region = 147 }
 0x45f   :  { %1074 = vsyncpa [#allocation3], 1 }
 0x460   :  { %1076 = vsyncpa [#allocation3 + $0x1], 1 }
 0x461   :  { %1077 = vsyncpa [#allocation5], 1 }

// kernel: _lambda_.4
= control target key start
LH: loop header
LB: loop body
LE: loop exit
PB: predicated region body
PF: predicated region fallthrough
CT: control target
= control target key end

     0   :  { %15 = vsyncpa [#allocation3], 0  ;;  %s1632_s0 = inlined_call_operand.vmem [shape: f32[16,16], index: 0, kind: input, shape index: {}]   ;;  %s1633_s1 = inlined_call_operand.vmem [shape: f32[16,16], index: 1, kind: input, shape index: {}]   ;;  %s1634_s2 = inlined_call_operand.vmem [shape: f32[16,3], index: 2, kind: input, shape index: {}]   ;;  %s1635_s3 = inlined_call_operand.hbm [shape: s32[2,16,1], index: 3, kind: input, shape index: {}]   ;;  %s1636_s4 = inlined_call_operand.vmem [shape: s32[2,16,1], index: 4, kind: input, shape index: {}]   ;;  %s1637_s5 = inlined_call_operand.vmem [shape: s32[2,1,16], index: 5, kind: input, shape index: {}]   ;;  %s1638_s6 = inlined_call_operand.vmem [shape: f32[2,16,28], index: 6, kind: input, shape index: {}]   ;;  %s1639_s7 = inlined_call_operand.vmem [shape: f32[2,16,22], index: 7, kind: input, shape index: {}]   ;;  %s1640_s8 = inlined_call_operand.vmem [shape: f32[2,16,128], index: 8, kind: output, shape index: {0}]   ;;  %s1641_s9 = inlined_call_operand.vmem [shape: f32[2,16,128], index: 9, kind: output, shape index: {1}]  }
   0x1   :  { %17 = vsyncpa [#allocation3 + $0x1], 0  ;;  %s1400_s30 = smov 0   ;;  %s1402_s10 = smov 0  }
   0x2   :  { %s1404_s11 = smov 0   ;;  %s1406_s12 = smov 0  }
   0x3 LB: > { %s1419_s13 = sadd.s32 4294967295, %s1340_s12   ;;  %s1422_s14 = sadd.s32 1, %s1340_s12   ;;  %s1340_s12 = sphi %s1406_s12, %s1648_s12   ;;  %s1336_s11 = sphi %s1404_s11, %s1647_s11   ;;  %s1332_s10 = sphi %s1402_s10, %s1646_s10   ;;  %s1328_s30 = sphi %s1400_s30, %s1645_s30  }
   0x4   : > { %s90_s15 = ssub.s32 %s1340_s12, %s1422_s14  ;;  %s93_s16 = sadd.s32 1, %s1336_s11 }
   0x5   : > { %p91_p0 = scmp.eq.s32.totalorder %s90_s15, 0  ;;  %p100_p1 = scmp.ne.s32.totalorder %s1336_s11, %s1332_s10 }
   0x6   : > { %p101_p2 = scmp.eq.s32.totalorder %s1340_s12, 0  ;;  %p106_p3 = scmp.ne.s32.totalorder %s1332_s10, %s1328_s30 }
   0x7   : > { %s1432_s17 = scalar_select %p91_p0, %s1336_s11, %s93_s16  }
   0x8   : > { %p1434_p4 = por %p101_p2, %p100_p1  ;;  %p107_p5 = scmp.eq.s32.totalorder %s1419_s13, 0 }
   0x9   : > { %p1205_p6 = scmp.lt.s32.totalorder %s1340_s12, 2  ;;  %s295_s20 = sand.u32 1, %s1336_s11  }
   0xa   : > { %p1440_p7 = por %p107_p5, %p106_p3  ;;  %s1141_s21 = sshll.u32 %s295_s20, 4 }
   0xb   : > { %s1193_s22 = sshll.u32 %s1340_s12, 4  ;;  %s299_s26 = scalar_lea.vmem [#allocation2], %s1141_s21 }
   0xc   : > { %s304_s25 = scalar_lea.hbm %s1635_s3, %s1193_s22  ;;  %s307_s27 = sshll.u32 %s299_s26, 4  ;;  %s308_s27 = int_to_ptr.vmem [resolvable:$true] %s307_s27 }
   0xd   : > { %s305_s28 = sshll.u32 %s304_s25, 4  ;;  %p1451_p8 = pnand %p1205_p6, %p1434_p4  ;;  %s306_s28 = int_to_ptr.hbm [resolvable:$true] %s305_s28 }
   0xe   : > { %p1144_p9 = scmp.ge.s32.totalorder %s1340_s12, 1  ;;  %s296_s30 = scalar_lea.sflag [#allocation3], %s295_s20 }
   0xf   : > { %s1276_s15 = sshra.s32 %s306_s28, 4  ;;  %p1280_p11 = pneg %p1451_p8  ;;  %s1277_s15 = int_to_ptr.hbm [resolvable:$true] %s1276_s15 }
  0x10   : > { %s1278_s16 = scalar_lea.hbm %s1277_s15, 16  ;;  %s1283_s23 = scalar_lea.hbm %s1635_s3, 32 }
  0x11   : > { %p1279_p10 = scmp.ne.s32.totalorder %s1277_s15, %s1278_s16  ;;  %p1284_p0 = scmp.lt.s32.totalorder %s1277_s15, %s1635_s3 }
  0x12   : > { %p1285_p1 = scmp.lt.s32.totalorder %s1283_s23, %s1278_s16 }
  0x13   : > { %p1281_p12 = pnand %p1280_p11, %p1279_p10 }
  0x14   : > { %p1286_p2 = por %p1285_p1, %p1284_p0 }
  0x15   : > { %p1282_p13 = pneg %p1281_p12 }
  0x17   : > { %p1287_p3 = pnand %p1286_p2, %p1282_p13 }
  0x19   : > { %1290 = shalt.err (!%p1287_p3)
}
  0x1a   : > { %s1342_s20 = smov 128   ;;  %s1343_s25 = smov 8  }
  0x1b   : > { %1204 = dma.hbm_to_vmem [thread:$0]  (!%p1451_p8), %s306_s28, 256, %s308_s27, %s296_s30, %s1342_s20, %s1342_s20, %s1343_s25  }
  0x1c   : > { %p345_p4 = scmp.lt.s32.totalorder %s1340_s12, 3 }
  0x1e   : > { %p346_p5 = pnand %p1144_p9, %p345_p4 }
  0x1f   : > { %s351_s26 = sand.u32 (!%p346_p5), 1, %s1332_s10  }
  0x20   : > { %349 = sbr.rel (%p346_p5) target bundleno = 1179 (0x49b), region = 52  ;;  %s1470_s21 = sshll.u32 (!%p346_p5), %s351_s26, 4 }
  0x21   : > { %s352_s15 = scalar_lea.sflag (!%p346_p5), [#allocation3], %s351_s26  ;;  %s355_s16 = scalar_lea.vmem (!%p346_p5), [#allocation2], %s1470_s21 }
  0x25   : > { %1323 = dma.done.wait (%p1440_p7), %s352_s15, 256  }
  0x26   : > { %1325 = vsyncadd (%p1440_p7), %s352_s15, 4294967040  ;;  %p414_p6 = scmp.lt.s32.totalorder %s1419_s13, 1  ;;  %v442_v2 = vld [vmem:[%s1632_s0] sm:$0xff]  ;;  %vm446_vm0 = vcmask 130048   ;;  %v443_v3 = vld [vmem:[%s1632_s0 + $0x8] sm:$0xff]  ;;  %v1344_v5 = vmov 0   ;;  %v509_v17 = vlaneseq }
  0x27   : > { %v511_v4 = vld [vmem:[%s355_s16] sm:$0xff]  ;;  %1256 = vset.pattern.permute.xlu1 %v1344_v5  ;;  %1257 = vset.pattern.permute.xlu2 %v1344_v5  ;;  %v512_v10 = vld [vmem:[%s355_s16 + $0x8] sm:$0xff]  ;;  %s1345_s30 = smov 106   ;;  %s1346_s22 = smov 112   ;;  %v1348_v25 = vmov 0.0   ;;  %vm668_vm8 = vcmask 1045504  }
  0x28   : > { %s1650_s13 = smov (!%p414_p6, %s1419_s13), 1  ;;  %514 = vperm.xlu1 %1256, %v511_v4   ;;  %1258 = vset.pattern.permute.xlu0 %v1344_v5  ;;  %v476_v9 = vld [vmem:[%s1633_s1] sm:$0xff]  ;;  %v477_v12 = vld [vmem:[%s1633_s1 + $0x8] sm:$0xff]  ;;  %v1516_v19 = vand.u32 127, %v509_v17  ;;  %s1347_s23 = smov 3   ;;  %v1559_v38 = vshrl.u32 %v509_v17, 7 }
  0x29   : > { %s1482_s12 = sshll.u32 %s1650_s13, 4  ;;  %517 = vperm.xlu2 %1257, %v512_v10   ;;  %v646_v22 = vld [vmem:[%s1634_s2] sm:$0xff]  ;;  %v647_v28 = vld [vmem:[%s1634_s2 + $0x8] sm:$0xff]  ;;  %vm656_vm9 = vcmask 23552   ;;  %vm661_vm10 = vcmask 48128   ;;  %s421_s26 = scalar_lea.vmem %s1637_s5, %s1650_s13  ;;  %vm809_vm13 = vcmask 1041408  }
  0x2a   : > { %s426_s29 = scalar_lea.vmem %s1638_s6, %s1482_s12  ;;  %s418_s20 = scalar_lea.vmem %s1636_s4, %s1482_s12  ;;  %v550_v37 = vmul.u32 3, %v1516_v19  ;;  %v557_v57 = vmul.u32 8, %v1559_v38 }
  0x2b   : > { %v445_v0 = vld [vmem:[%s426_s29 + $0x8] sm:$0xff]  ;;  %v444_v1 = vld [vmem:[%s426_s29] sm:$0xff]  ;;  %s431_s15 = scalar_lea.vmem %s1639_s7, %s1482_s12  ;;  %s1349_s13 = smov 120  }
  0x2c   : > { %467 = vmatpush.msra.mxu0 %v445_v0  ;;  %v525_v6 = vld [vmem:[%s418_s20] sm:$0xff]  ;;  %v479_v7 = vld [vmem:[%s431_s15 + $0x8] sm:$0xff]  ;;  %v552_v39 = vadd.s32 3, %v550_v37  ;;  %vm551_vm5 = vcmp.ge.s32.totalorder %v1559_v38, %v550_v37  ;;  %vm558_vm11 = vcmp.ge.s32.totalorder %v1516_v19, %v557_v57  ;;  %v559_v59 = vadd.s32 8, %v557_v57  ;;  %s436_s19 = scalar_lea.vmem %s1640_s8, %s1482_s12  ;;  %s441_s21 = scalar_lea.vmem %s1641_s9, %s1482_s12 }
  0x2d   : > { %v478_v8 = vld [vmem:[%s431_s15] sm:$0xff]  ;;  %500 = vmatpush.msra.mxu1 %v479_v7  ;;  %v526_v11 = vld [vmem:[%s418_s20 + $0x8] sm:$0xff] }
  0x2e   : > { %468 = vmatpush.msra.mxu0 %v444_v1  ;;  %vm553_vm6 = vcmp.lt.s32.totalorder %v1559_v38, %v552_v39  ;;  %vm560_vm12 = vcmp.lt.s32.totalorder %v1516_v19, %v559_v59 }
  0x2f   : > { %1156 = vmatmul.msk.f32.vlgmr.msra.gmra.mxu0 %vm446_vm0, %v442_v2  ;;  %501 = vmatpush.msra.mxu1 %v478_v8  ;;  %vm554_vm7 = vmand %vm551_vm5, %vm553_vm6 }
  0x30   : > { %528 = vperm.xlu1 %1256, %v525_v6   ;;  %1158 = vmatmul.msk.f32.vlgmr.msra.gmra.mxu1 %vm446_vm0, %v476_v9  ;;  %v1166_v40 = vsel %vm554_vm7, 1.0, %v1348_v25  ;;  %vm561_vm14 = vmand %vm558_vm11, %vm560_vm12 }
  0x31   : > { %531 = vperm.xlu2 %1257, %v526_v11   ;;  %1172 = vmatpush.msk.msrb.mxu0 %vm668_vm8, %v1166_v40  ;;  %v1167_v61 = vsel %vm561_vm14, 1.0, %v1348_v25 }
  0x37   : > { %1157 = vmatmul.msk.f32.gmra.mxu0 %vm446_vm0, %v443_v3 }
  0x38   : > { %1159 = vmatmul.msk.f32.gmra.mxu1 %vm446_vm0, %v477_v12  ;;  %650 = vrot.lane.b32.xlu1 %v646_v22, %s1347_s23 }
  0x83   : > { %v518_v18 = vpop.permute.xlu2 %517 }
  0x84   : > { %vm520_vm4 = vcmp.eq.s32.totalorder %v1516_v19, %v518_v18 }
  0x85   : > { %v1550_v36 = vsel %vm520_vm4, 1.0, %v1348_v25 }
  0x8b   : > { %v532_v29 = vpop.permute.xlu2 %531 }
  0x8c   : > { %vm534_vm2 = vcmp.eq.s32.totalorder %v1516_v19, %v532_v29 }
  0x8d   : > { %v1539_v33 = vsel %vm534_vm2, 1.0, %v1348_v25 }
  0x9a   : > { %v515_v16 = vpop.permute.xlu1 %514 }
  0x9b   : > { %vm519_vm3 = vcmp.eq.s32.totalorder %v1516_v19, %v515_v16 }
  0x9c   : > { %v1542_v35 = vsel %vm519_vm3, 1.0, %v1348_v25 }
  0xa2   : > { %v529_v20 = vpop.permute.xlu1 %528 }
  0xa3   : > { %vm533_vm1 = vcmp.eq.s32.totalorder %v1516_v19, %v529_v20  ;;  %v541_v19 = vadd.s32 8, %v1559_v38 }
  0xa4   : > { %v1526_v26 = vsel %vm533_vm1, 1.0, %v1348_v25  ;;  %vm701_vm1 = vcmask 15360  }
  0xaa   : > { %v651_v43 = vpop.permute.xlu1 %650 }
  0xab   : > { %v657_v46 = vsel %vm656_vm9, %v646_v22, %v651_v43 }
  0xac   : > { %v470_v13 = vpop.f32.mrf.mxu0 }
  0xad   : > { %v1518_v21 = vpop.f32.mrf.mxu1 }
  0xb4   : > { %v473_v14 = vpop.f32.mrf.mxu0 }
  0xb5   : > { %v1246_v15 = vpack.i.bf16 %v470_v13, %v473_v14  ;;  %v1533_v30 = vpop.f32.mrf.mxu1 }
  0xb6   : > { %640 = vrot.lane.b32.xlu2 %v1533_v30, %s1346_s22 }
  0xb7   : > { %1247 = vrot.lane.b32.xlu0 %v1246_v15, %s1345_s30 }
  0xbf   : > { %1252 = vrot.lane.b32.xlu0 %v1246_v15, %s1346_s22  ;;  %v1259_v15 = vld [vmem:[%s421_s26] ss:$0 sm:$0xff] }
  0xc0   : > { %vm544_vm3 = vcmp.eq.s32.totalorder %v1559_v38, %v1259_v15  ;;  %vm545_vm4 = vcmp.eq.s32.totalorder %v541_v19, %v1259_v15 }
  0xc1   : > { %v1164_v18 = vsel %vm544_vm3, 1.0, %v1348_v25  ;;  %v1165_v20 = vsel %vm545_vm4, 1.0, %v1348_v25 }
  0xc7   : > { %638 = vrot.lane.b32.xlu0 %v1518_v21, %s1346_s22 }
  0xcf   : > { %652 = vrot.lane.b32.xlu0 %v647_v28, %s1347_s23 }
 0x110   : > { %v641_v49 = vpop.permute.xlu2 %640 }
 0x129   : > { %v1248_v23 = vpop.permute.xlu0 %1247 }
 0x12a   : > { %v1249_v24 = vunpack.i.l.bf16 %v1248_v23  ;;  %v1250_v27 = vunpack.i.h.bf16 %v1248_v23 }
 0x12c   : > { %592 = vmatpush.msra.mxu2 %v1249_v24 }
 0x12e   : > { %593 = vmatpush.msra.mxu2 %v1250_v27 }
 0x12f   : > { %1168 = vmatmul.msk.f32.vlgmr.msra.gmra.mxu2 %vm446_vm0, %v1526_v26 }
 0x130   : > { %794 = vmatpush.msrb.mxu2 %v473_v14 }
 0x131   : > { %v1253_v31 = vpop.permute.xlu0 %1252 }
 0x132   : > { %795 = vmatpush.msrb.mxu2 %v470_v13  ;;  %v1254_v32 = vunpack.i.l.bf16 %v1253_v31  ;;  %v1255_v34 = vunpack.i.h.bf16 %v1253_v31 }
 0x134   : > { %627 = vmatpush.msra.mxu3 %v1254_v32 }
 0x136   : > { %628 = vmatpush.msra.mxu3 %v1255_v34 }
 0x137   : > { %1169 = vmatmul.msk.f32.gmra.mxu2 %vm446_vm0, %v1539_v33  ;;  %1170 = vmatmul.msk.f32.vlgmr.msra.gmra.mxu3 %vm446_vm0, %v1542_v35 }
 0x138   : > { %1179 = vmatpush.msk.msrb.mxu3 %vm809_vm13, %v1167_v61 }
 0x139   : > { %v639_v41 = vpop.permute.xlu0 %638 }
 0x13f   : > { %1171 = vmatmul.msk.f32.gmra.mxu3 %vm446_vm0, %v1550_v36  ;;  %1177 = vmatmul.msk.f32.vlgmr.msrb.gmra.mxu2 %vm446_vm0, %v1542_v35 }
 0x141   : > { %v653_v50 = vpop.permute.xlu0 %652 }
 0x142   : > { %v658_v54 = vsel %vm656_vm9, %v647_v28, %v653_v50 }
 0x147   : > { %1178 = vmatmul.msk.f32.gmra.mxu2 %vm446_vm0, %v1550_v36 }
 0x1b2   : > { %v595_v42 = vpop.f32.mrf.mxu2 }
 0x1ba   : > { %v630_v44 = vpop.f32.mrf.mxu3  ;;  %v598_v51 = vpop.f32.mrf.mxu2 }
 0x1bb   : > { %v631_v45 = vadd.f32 %v630_v44, %v595_v42 }
 0x1bd   : > { %v644_v47 = vadd.f32 %v639_v41, %v631_v45 }
 0x1bf   : > { %v659_v48 = vmul.f32 %v657_v46, %v644_v47 }
 0x1c1   : > { %1173 = vmatmul.msk.f32.vlgmr.msrb.gmra.mxu0 %vm661_vm10, %v659_v48 }
 0x1c2   : > { %v633_v52 = vpop.f32.mrf.mxu3  ;;  %v797_v22 = vpop.f32.mrf.mxu2 }
 0x1c3   : > { %v634_v53 = vadd.f32 %v633_v52, %v598_v51 }
 0x1c5   : > { %v645_v55 = vadd.f32 %v641_v49, %v634_v53 }
 0x1c7   : > { %v660_v56 = vmul.f32 %v658_v54, %v645_v55 }
 0x1c9   : > { %1174 = vmatmul.msk.f32.gmra.mxu0 %vm661_vm10, %v660_v56 }
 0x1ca   : > { %v800_v31 = vpop.f32.mrf.mxu2 }
 0x23e   : > { %v689_v58 = vpop.f32.mrf.mxu0 }
 0x23f   : > { %v697_v60 = vmul.f32 0.2, %v689_v58  ;;  %vm695_vm15 = vcmp.ge.f32.partialorder %v689_v58, 0.0 }
 0x241   : > { %v699_v63 = vsel %vm695_vm15, %v689_v58, %v697_v60  ;;  %vm964_vm15 = vcmask 64512  }
 0x242   : > { %v702_v2 = vsel %vm701_vm1, %v699_v63, -inf }
 0x246   : > { %v692_v62 = vpop.f32.mrf.mxu0 }
 0x247   : > { %vm696_vm2 = vcmp.ge.f32.partialorder %v692_v62, 0.0  ;;  %v698_v0 = vmul.f32 0.2, %v692_v62 }
 0x249   : > { %v700_v1 = vsel %vm696_vm2, %v692_v62, %v698_v0 }
 0x24a   : > { %v703_v3 = vsel %vm701_vm1, %v700_v1, -inf }
 0x24b   : > { %v704_v4 = vmax.f32 %v702_v2, %v703_v3 }
 0x24d   : > { %v705_v5 = vrot.slane %v704_v4, 4 }
 0x24f   : > { %v706_v6 = vmax.f32 %v704_v4, %v705_v5 }
 0x251   : > { %v707_v7 = vrot.slane %v706_v6, 2 }
 0x253   : > { %v708_v8 = vmax.f32 %v706_v6, %v707_v7 }
 0x255   : > { %v709_v9 = vrot.slane %v708_v8, 1 }
 0x257   : > { %v710_v10 = vmax.f32 %v708_v8, %v709_v9 }
 0x259   : > { %v711_v11 = vsub.f32 %v699_v63, %v710_v10  ;;  %v712_v12 = vsub.f32 %v700_v1, %v710_v10 }
 0x25b   : > { %v713_v13 = vmul.f32 1.442695, %v711_v11  ;;  %v715_v14 = vmul.f32 1.442695, %v712_v12 }
 0x25d   : > { %1260 = vpow2.f32 %v713_v13 }
 0x25e   : > { %1262 = vpow2.f32 %v715_v14 }
 0x263   : > { %v1261_v16 = vpop.eup %1260 }
 0x264   : > { %v1263_v17 = vpop.eup %1262  ;;  %1180 = vmatmul.msk.f32.vlgmr.msrb.gmra.mxu3 %vm701_vm1, %v1261_v16 }
 0x265   : > { %737 = vmatpush.msrb.mxu1 %v1263_v17 }
 0x267   : > { %738 = vmatpush.msrb.mxu1 %v1261_v16 }
 0x268   : > { %1175 = vmatmul.msk.f32.vlgmr.msrb.gmra.mxu1 %vm446_vm0, %v1164_v18 }
 0x269   : > { %1184 = vmatpush.msk.msra.mxu1 %vm809_vm13, %v1167_v61 }
 0x26c   : > { %1181 = vmatmul.msk.f32.gmra.mxu3 %vm701_vm1, %v1263_v17 }
 0x270   : > { %1176 = vmatmul.msk.f32.gmra.mxu1 %vm446_vm0, %v1165_v20 }
 0x2e5   : > { %v740_v23 = vpop.f32.mrf.mxu1 }
 0x2e6   : > { %1264 = vrcp.f32 %v740_v23  ;;  %v759_v38 = vand.u32 2147483648, %v740_v23  ;;  %v757_v40 = vand.u32 2147483647, %v740_v23  ;;  %vm753_vm6 = vweird.f32 %v740_v23 }
 0x2e7   : > { %v830_v24 = vpop.f32.mrf.mxu3  ;;  %vm746_vm9 = vcmp.gt.f32.partialorder %v740_v23, 0.0 }
 0x2e8   : > { %v836_v41 = vmul.f32 %v830_v24, %v797_v22  ;;  %v760_v43 = vor.u32 1.1754944e-38, %v759_v38  ;;  %vm758_vm8 = vcmp.eq.f32.partialorder %v757_v40, 8.507059e+37 }
 0x2ec   : > { %v1265_v27 = vpop.eup %1264 }
 0x2ed   : > { %v749_v28 = vmul.f32 %v1265_v27, %v740_v23  ;;  %v743_v29 = vpop.f32.mrf.mxu1  ;;  %vm754_vm5 = vweird.f32 %v1265_v27 }
 0x2ee   : > { %1266 = vrcp.f32 %v743_v29  ;;  %vm755_vm7 = vmor %vm753_vm6, %vm754_vm5  ;;  %v774_v49 = vand.u32 2147483648, %v743_v29  ;;  %v772_v51 = vand.u32 2147483647, %v743_v29  ;;  %vm768_vm11 = vweird.f32 %v743_v29 }
 0x2ef   : > { %v750_v32 = vsub.f32 1.0, %v749_v28  ;;  %v833_v34 = vpop.f32.mrf.mxu3  ;;  %vm747_vm14 = vcmp.gt.f32.partialorder %v743_v29, 0.0 }
 0x2f0   : > { %v837_v37 = vmul.f32 %v833_v34, %v800_v31  ;;  %v775_v53 = vor.u32 1.1754944e-38, %v774_v49  ;;  %vm773_vm13 = vcmp.eq.f32.partialorder %v772_v51, 8.507059e+37 }
 0x2f1   : > { %v751_v39 = vmul.f32 %v1265_v27, %v750_v32 }
 0x2f2   : > { %852 = vmatpush.msra.mxu0 %v837_v37 }
 0x2f3   : > { %v752_v25 = vadd.f32 %v1265_v27, %v751_v39 }
 0x2f4   : > { %v1267_v42 = vpop.eup %1266  ;;  %853 = vmatpush.msra.mxu0 %v836_v41 }
 0x2f5   : > { %v764_v44 = vmul.f32 %v1267_v42, %v743_v29  ;;  %1182 = vmatmul.msk.f32.vlgmr.msra.gmra.mxu0 %vm446_vm0, %v1164_v18  ;;  %v756_v45 = vsel %vm755_vm7, %v1265_v27, %v752_v25  ;;  %vm769_vm10 = vweird.f32 %v1267_v42 }
 0x2f6   : > { %v761_v46 = vsel %vm758_vm8, %v760_v43, %v756_v45  ;;  %vm770_vm12 = vmor %vm768_vm11, %vm769_vm10 }
 0x2f7   : > { %v765_v47 = vsub.f32 1.0, %v764_v44  ;;  %v778_v48 = vsel %vm746_vm9, %v761_v46, 0.0 }
 0x2f8   : > { %1185 = vmatmul.msk.f32.vlgmr.msra.gmra.mxu1 %vm701_vm1, %v778_v48 }
 0x2f9   : > { %v766_v50 = vmul.f32 %v1267_v42, %v765_v47 }
 0x2fb   : > { %v767_v52 = vadd.f32 %v1267_v42, %v766_v50 }
 0x2fd   : > { %1183 = vmatmul.msk.f32.gmra.mxu0 %vm446_vm0, %v1165_v20  ;;  %v771_v54 = vsel %vm770_vm12, %v1267_v42, %v767_v52 }
 0x2fe   : > { %v776_v55 = vsel %vm773_vm13, %v775_v53, %v771_v54 }
 0x2ff   : > { %v779_v56 = vsel %vm747_vm14, %v776_v55, 0.0 }
 0x300   : > { %1186 = vmatmul.msk.f32.gmra.mxu1 %vm701_vm1, %v779_v56 }
 0x372   : > { %v855_v57 = vpop.f32.mrf.mxu0 }
 0x375   : > { %v884_v58 = vpop.f32.mrf.mxu1 }
 0x376   : > { %v890_v59 = vmul.f32 %v884_v58, %v855_v57 }
 0x378   : > { %946 = vrot.lane.b32.xlu1 %v890_v59, %s1349_s13 }
 0x37a   : > { %v858_v60 = vpop.f32.mrf.mxu0 }
 0x37d   : > { %v887_v61 = vpop.f32.mrf.mxu1 }
 0x37e   : > { %v891_v62 = vmul.f32 %v887_v61, %v858_v60 }
 0x380   : > { %948 = vrot.lane.b32.xlu2 %v891_v62, %s1349_s13  ;;  %906 = vmatpush.msra.mxu2 %v891_v62 }
 0x381   : > { %931 = vmatpush.msra.mxu3 %v891_v62 }
 0x382   : > { %907 = vmatpush.msra.mxu2 %v890_v59 }
 0x383   : > { %932 = vmatpush.msra.mxu3 %v890_v59  ;;  %1187 = vmatmul.msk.f32.vlgmr.msra.gmra.mxu2 %vm446_vm0, %v1542_v35 }
 0x384   : > { %1189 = vmatmul.msk.f32.vlgmr.msra.gmra.mxu3 %vm446_vm0, %v1526_v26 }
 0x38b   : > { %1188 = vmatmul.msk.f32.gmra.mxu2 %vm446_vm0, %v1550_v36 }
 0x38c   : > { %1190 = vmatmul.msk.f32.gmra.mxu3 %vm446_vm0, %v1539_v33 }
 0x3da   : > { %v949_v63 = vpop.permute.xlu2 %948 }
 0x3db   : > { %v953_v0 = vadd.f32 %v949_v63, %v891_v62 }
 0x3dd   : > { %v955_v1 = vmul.f32 0.5, %v953_v0 }
 0x3df   : > { %v957_v2 = vmul.f32 0.5, %v955_v1 }
 0x3e1   : > { %1268 = vtanh.f32 %v957_v2 }
 0x3e7   : > { %v1269_v3 = vpop.eup %1268 }
 0x3e8   : > { %v961_v4 = vadd.f32 1.0, %v1269_v3 }
 0x3ea   : > { %v963_v35 = vmul.f32 0.5, %v961_v4  ;;  %v947_v26 = vpop.permute.xlu1 %946 }
 0x3eb   : > { %v952_v5 = vadd.f32 %v947_v26, %v890_v59 }
 0x3ec   : > { %v966_v36 = vsel %vm964_vm15, %v963_v35, 0.0 }
 0x3ed   : > { %968 = vst [vmem:[%s436_s19 + $0x8] sm:$0xff] %v966_v36  ;;  %v954_v6 = vmul.f32 0.5, %v952_v5 }
 0x3ef   : > { %v956_v33 = vmul.f32 0.5, %v954_v6 }
 0x3f1   : > { %1270 = vtanh.f32 %v956_v33 }
 0x3f7   : > { %v1271_v7 = vpop.eup %1270 }
 0x3f8   : > { %v960_v8 = vadd.f32 1.0, %v1271_v7 }
 0x3fa   : > { %v962_v9 = vmul.f32 0.5, %v960_v8 }
 0x3fc   : > { %v965_v10 = vsel %vm964_vm15, %v962_v9, 0.0 }
 0x3fd   : > { %967 = vst [vmem:[%s436_s19] sm:$0xff] %v965_v10 }
 0x406   : > { %v909_v11 = vpop.f32.mrf.mxu2 }
 0x407   : > { %v915_v12 = vadd.f32 %v909_v11, %v1518_v21  ;;  %v934_v13 = vpop.f32.mrf.mxu3 }
 0x409   : > { %v940_v14 = vadd.f32 %v934_v13, %v915_v12 }
 0x40b   : > { %v942_v15 = vmul.f32 0.33333334, %v940_v14 }
 0x40d   : > { %971 = vrot.lane.b32.xlu0 %v942_v15, %s1349_s13 }
 0x40e   : > { %v912_v16 = vpop.f32.mrf.mxu2 }
 0x40f   : > { %v916_v17 = vadd.f32 %v912_v16, %v1533_v30  ;;  %v937_v18 = vpop.f32.mrf.mxu3 }
 0x411   : > { %v941_v19 = vadd.f32 %v937_v18, %v916_v17 }
 0x413   : > { %v943_v20 = vmul.f32 0.33333334, %v941_v19 }
 0x415   : > { %973 = vrot.lane.b32.xlu1 %v943_v20, %s1349_s13 }
 0x47f   : > { %v972_v22 = vpop.permute.xlu0 %971 }
 0x480   : > { %v977_v23 = vadd.f32 %v972_v22, %v942_v15 }
 0x482   : > { %v979_v24 = vmul.f32 0.5, %v977_v23 }
 0x484   : > { %v981_v27 = vmul.f32 0.5, %v979_v24 }
 0x486   : > { %1272 = vtanh.f32 %v981_v27 }
 0x487   : > { %v974_v21 = vpop.permute.xlu1 %973 }
 0x488   : > { %v978_v28 = vadd.f32 %v974_v21, %v943_v20 }
 0x48a   : > { %v980_v29 = vmul.f32 0.5, %v978_v28 }
 0x48c   : > { %v1273_v31 = vpop.eup %1272  ;;  %v982_v32 = vmul.f32 0.5, %v980_v29 }
 0x48d   : > { %v985_v34 = vadd.f32 1.0, %v1273_v31 }
 0x48e   : > { %1274 = vtanh.f32 %v982_v32 }
 0x48f   : > { %v987_v30 = vmul.f32 0.5, %v985_v34 }
 0x491   : > { %v989_v37 = vsel %vm964_vm15, %v987_v30, 0.0 }
 0x492   : > { %991 = vst [vmem:[%s441_s21] sm:$0xff] %v989_v37 }
 0x494   : > { %v1275_v38 = vpop.eup %1274 }
 0x495   : > { %v986_v39 = vadd.f32 1.0, %v1275_v38 }
 0x497   : > { %v988_v40 = vmul.f32 0.5, %v986_v39 }
 0x499   : > { %v990_v41 = vsel %vm964_vm15, %v988_v40, 0.0 }
 0x49a   : > { %992 = vst [vmem:[%s441_s21 + $0x8] sm:$0xff] %v990_v41 }
 0x49b PF: > { %p20_p7 = scmp.ge.s32.totalorder %s1422_s14, 4   ;;  %s1645_s30 = smov %s1332_s10 }
 0x49c   : > { %s1646_s10 = smov %s1336_s11  ;;  %s1647_s11 = smov %s1432_s17 }
 0x49d   : > { %s1648_s12 = smov %s1422_s14  ;;  %22 = sbr.rel (!%p20_p7) target bundleno = 3 (0x3), region = 116 }
 0x4a2   :  { %1030 = vsyncpa [#allocation3], 1 }
 0x4a3   :  { %1032 = vsyncpa [#allocation3 + $0x1], 1 }

</bundles_post_ra>
